<compile_context>
chip_gen: v7x
topology: tpu7x:2x2x1
jax: 0.10.0
libtpu: 0.0.40
codegen_flags: <defaults>
</compile_context>

<pallas_src>
import math
import functools

import jax
import jax.numpy as jnp
from jax.experimental import pallas as pl
from jax.experimental.pallas import tpu as pltpu

# ----------------------- configuration (module defaults, small sizes) --------
B = 8            # batch
S = 8            # sequence length
H = 128          # hidden_size (pooled_output_dim)
M = 256          # num_inducing
C = 28           # num_classes (module default)
C_PAD = 128      # lane-dense padded class dim (sliced back to C in the wrapper)

GP_KERNEL_SCALE = 1.0
GP_INPUT_SCALE = 1.0 / math.sqrt(GP_KERNEL_SCALE)   # scales gp_feature (as in reference)
GP_OUTPUT_BIAS = 0.0
LN_EPS = 1e-12
SPEC_NORM_BOUND = 0.95
N_POWER_ITERATIONS = 1
GP_COV_MOMENTUM = 0.999
GP_COV_RIDGE_PENALTY = 0.001

# rows of the packed "vecs" (8, M) tile
ROW_BP, ROW_GAMMA, ROW_BETA, ROW_BRF, ROW_BOUT = 0, 1, 2, 3, 4


# ----------------------- Pallas kernel ---------------------------------------
def sngp_kernel(x_ref, wp_ref, vecs_ref, wrf_ref, wout_ref, prec_ref,
                out_ref, feat_ref, prec_new_ref,
                *, gp_input_scale, ln_eps, momentum, cov_scale):
    h = x_ref.shape[-1]
    c_pad = out_ref.shape[-1]

    # extract_bert_features: spectral-normalized pooled linear on the CLS token
    x = x_ref[...]                                                        # (B, H)
    pooled = jnp.dot(x, wp_ref[...], preferred_element_type=jnp.float32)  # (B, H)
    pooled = pooled + vecs_ref[ROW_BP:ROW_BP + 1, :h]                     # + bias

    # gp_layer: input LayerNorm (biased variance, eps inside rsqrt)
    mu = jnp.mean(pooled, axis=-1, keepdims=True)
    var = jnp.mean((pooled - mu) ** 2, axis=-1, keepdims=True)
    xn = (pooled - mu) * jax.lax.rsqrt(var + ln_eps)
    xn = (xn * vecs_ref[ROW_GAMMA:ROW_GAMMA + 1, :h]
          + vecs_ref[ROW_BETA:ROW_BETA + 1, :h])                          # gamma, beta

    # random Fourier features: cos(x @ W_rf + b_rf) * gp_input_scale
    proj = (jnp.dot(xn, wrf_ref[...], preferred_element_type=jnp.float32)
            + vecs_ref[ROW_BRF:ROW_BRF + 1, :])                           # (B, M)
    feat = jnp.cos(proj) * gp_input_scale                                 # (B, M)
    feat_ref[...] = feat

    # GP output layer (no weight bias) + constant gp_output_bias (lane-padded)
    out_ref[...] = (jnp.dot(feat, wout_ref[...], preferred_element_type=jnp.float32)
                    + vecs_ref[ROW_BOUT:ROW_BOUT + 1, :c_pad])            # (B, C_PAD)

    # update_cov: Gram via dot_general over dim 0 (no transpose), scalars folded
    gram = jax.lax.dot_general(feat, feat,
                               dimension_numbers=(((0,), (0,)), ((), ())),
                               preferred_element_type=jnp.float32)        # (M, M)
    prec_new_ref[...] = momentum * prec_ref[...] + cov_scale * gram


# ----------------------- wrapper ----------------------------------------------
@functools.partial(jax.jit, donate_argnums=(5,))
def sngp_forward(latent, wp, vecs, wrf, wout_pad, prec):
    # Slice the CLS token outside the kernel: only (B, H) is DMA'd HBM->VMEM.
    lat_cls = latent[:, 0, :]

    kernel = functools.partial(
        sngp_kernel,
        gp_input_scale=GP_INPUT_SCALE,
        ln_eps=LN_EPS,
        momentum=GP_COV_MOMENTUM,
        cov_scale=(1.0 - GP_COV_MOMENTUM) / float(B),
    )
    vmem = pl.BlockSpec(memory_space=pltpu.MemorySpace.VMEM)

    flops = 2 * (B * H * H + B * H * M + B * M * C_PAD + B * M * M)
    bytes_accessed = 4 * (B * H + H * H + 8 * M + H * M + M * C_PAD
                          + M * M                      # prec in
                          + B * C_PAD + B * M + M * M  # outputs
                          )

    out_pad, gp_feature, prec_new = pl.pallas_call(
        kernel,
        out_shape=(
            jax.ShapeDtypeStruct((B, C_PAD), jnp.float32),   # gp_output (padded)
            jax.ShapeDtypeStruct((B, M), jnp.float32),       # gp_feature
            jax.ShapeDtypeStruct((M, M), jnp.float32),       # updated precision matrix
        ),
        in_specs=[vmem] * 6,
        out_specs=(vmem, vmem, vmem),
        input_output_aliases={5: 2},                         # prec -> prec_new (in place)
        cost_estimate=pl.CostEstimate(
            flops=flops, transcendentals=B * M, bytes_accessed=bytes_accessed),
    )(lat_cls, wp, vecs, wrf, wout_pad, prec)

    return out_pad[:, :C], gp_feature, prec_new


# ----------------------- parameter init (deterministic, mirrors __init__) ----
def init_params(key):
    ks = jax.random.split(key, 6)

    # BertLinear(H, H): weight ~ N(0, 0.02), bias = 0   (PyTorch shape (out, in))
    w_pool_raw = 0.02 * jax.random.normal(ks[0], (H, H), jnp.float32)
    b_pool = jnp.zeros((1, H), jnp.float32)

    # bounded spectral norm (SNGP-style): one power iteration, then scale by
    # norm_bound/sigma if that ratio < 1.
    # TODO(synk): exact custom `spectral_norm` impl not given; standard bounded variant used.
    u = jax.random.normal(ks[1], (H,), jnp.float32)
    u = u / (jnp.linalg.norm(u) + 1e-12)
    for _ in range(N_POWER_ITERATIONS):
        v = w_pool_raw.T @ u
        v = v / (jnp.linalg.norm(v) + 1e-12)
        u = w_pool_raw @ v
        u = u / (jnp.linalg.norm(u) + 1e-12)
    sigma = u @ (w_pool_raw @ v)
    scale = jnp.where(SPEC_NORM_BOUND / sigma < 1.0, SPEC_NORM_BOUND / sigma, 1.0)
    w_pool = (scale * w_pool_raw).T                         # (in, out) for kernel

    # LayerNorm(H) affine params
    gamma = jnp.ones((1, H), jnp.float32)
    beta = jnp.zeros((1, H), jnp.float32)

    # RandomFeatureLinear(H, M): weight ~ N(0, 0.05), bias ~ U[0, 2*pi)
    w_rf = (0.05 * jax.random.normal(ks[2], (M, H), jnp.float32)).T       # (H, M)
    b_rf = jax.random.uniform(ks[3], (1, M), jnp.float32, 0.0, 2.0 * math.pi)

    # _gp_output_layer: nn.Linear(M, C, bias=False), default-ish uniform init
    bound = 1.0 / math.sqrt(M)
    w_out = jax.random.uniform(ks[4], (C, M), jnp.float32, -bound, bound).T  # (M, C)
    b_out = jnp.full((1, C), GP_OUTPUT_BIAS, jnp.float32)   # _gp_output_bias

    # initial precision matrix: ridge * I
    prec = GP_COV_RIDGE_PENALTY * jnp.eye(M, dtype=jnp.float32)

    return w_pool, b_pool, gamma, beta, w_rf, b_rf, w_out, b_out, prec


# ----------------------- pure-JAX reference for verification -----------------
def sngp_reference(latent, wp, bp, gamma, beta, wrf, brf, wout, bout, prec):
    x = latent[:, 0, :]
    pooled = x @ wp + bp
    mu = jnp.mean(pooled, axis=-1, keepdims=True)
    var = jnp.mean((pooled - mu) ** 2, axis=-1, keepdims=True)
    xn = (pooled - mu) / jnp.sqrt(var + LN_EPS) * gamma + beta
    feat = jnp.cos(xn @ wrf + brf) * GP_INPUT_SCALE
    out = feat @ wout + bout
    prec_mb = (feat.T @ feat) / float(B)
    prec_new = GP_COV_MOMENTUM * prec + (1.0 - GP_COV_MOMENTUM) * prec_mb
    return out, feat, prec_new


if __name__ == "__main__":
    key = jax.random.PRNGKey(0)
    k_lat, k_par = jax.random.split(key)

    # synthetic backbone output: latent_feature (B, S, H)
    latent = jax.random.normal(k_lat, (B, S, H), jnp.float32)
    (w_pool, b_pool, gamma, beta, w_rf, b_rf, w_out, b_out, prec) = init_params(k_par)

    # Reference first (prec is donated to the kernel call below).
    ref_out, ref_feat, ref_prec = sngp_reference(
        latent, w_pool, b_pool, gamma, beta, w_rf, b_rf, w_out, b_out, prec)
    jax.block_until_ready((ref_out, ref_feat, ref_prec))

    # Kernel-side packing (done once, outside the jitted call):
    #   vecs row 0: pooled-linear bias, row 1: LN gamma, row 2: LN beta,
    #   row 3: RFF bias (full M lanes), row 4: GP output bias lane-padded to C_PAD.
    vecs = jnp.zeros((8, M), jnp.float32)
    vecs = vecs.at[ROW_BP, :H].set(b_pool[0])
    vecs = vecs.at[ROW_GAMMA, :H].set(gamma[0])
    vecs = vecs.at[ROW_BETA, :H].set(beta[0])
    vecs = vecs.at[ROW_BRF, :].set(b_rf[0])
    vecs = vecs.at[ROW_BOUT, :C].set(b_out[0])
    # GP output weights lane-padded to 128 for an unmasked lane-dense final store.
    w_out_pad = jnp.zeros((M, C_PAD), jnp.float32).at[:, :C].set(w_out)     # (M, C_PAD)

    gp_output, gp_feature, prec_new = sngp_forward(
        latent, w_pool, vecs, w_rf, w_out_pad, prec)
    jax.block_until_ready((gp_output, gp_feature, prec_new))

    assert jnp.allclose(gp_output, ref_out, atol=1e-4, rtol=1e-4)
    assert jnp.allclose(gp_feature, ref_feat, atol=1e-4, rtol=1e-4)
    assert jnp.allclose(prec_new, ref_prec, atol=1e-4, rtol=1e-4)

    print("KERNEL_OK")
</pallas_src>

<mosaic_0001>
module attributes {stable_mosaic.version = 11 : i64} {
  func.func @sngp_kernel(%arg0: memref<8x128xf32, #tpu.memory_space<vmem>>, %arg1: memref<128x128xf32, #tpu.memory_space<vmem>>, %arg2: memref<8x256xf32, #tpu.memory_space<vmem>>, %arg3: memref<128x256xf32, #tpu.memory_space<vmem>>, %arg4: memref<256x128xf32, #tpu.memory_space<vmem>>, %arg5: memref<256x256xf32, #tpu.memory_space<vmem>>, %arg6: memref<8x128xf32, #tpu.memory_space<vmem>>, %arg7: memref<8x256xf32, #tpu.memory_space<vmem>>, %arg8: memref<256x256xf32, #tpu.memory_space<vmem>>) attributes {dimension_semantics = [], scalar_prefetch = 0 : i64, scratch_operands = 0 : i64, tpu.core_type = #tpu.core_type<tc>} {
    %c0 = arith.constant 0 : index
    %c0_0 = arith.constant 0 : index
    %0 = vector.load %arg0[%c0, %c0_0] : memref<8x128xf32, #tpu.memory_space<vmem>>, vector<8x128xf32>
    %c0_1 = arith.constant 0 : index
    %c0_2 = arith.constant 0 : index
    %1 = vector.load %arg1[%c0_1, %c0_2] : memref<128x128xf32, #tpu.memory_space<vmem>>, vector<128x128xf32>
    %cst = arith.constant dense<0.000000e+00> : vector<8x128xf32>
    %2 = tpu.matmul %0, %1, %cst {dimension_numbers = #tpu.dot_dimension_numbers<[1], [0], [0], [1], [0, 0, 1, 1], [], []>} : vector<8x128xf32>, vector<128x128xf32>, vector<8x128xf32> -> vector<8x128xf32>
    %c0_3 = arith.constant 0 : index
    %c0_4 = arith.constant 0 : index
    %3 = vector.load %arg2[%c0_3, %c0_4] : memref<8x256xf32, #tpu.memory_space<vmem>>, vector<1x128xf32>
    %4 = vector.broadcast %3 : vector<1x128xf32> to vector<8x128xf32>
    %5 = arith.addf %2, %4 : vector<8x128xf32>
    %cst_5 = arith.constant dense<0.000000e+00> : vector<8xf32>
    %6 = vector.multi_reduction <add>, %5, %cst_5 [1] : vector<8x128xf32> to vector<8xf32>
    %7 = vector.shape_cast %6 : vector<8xf32> to vector<8x1xf32>
    %cst_6 = arith.constant 1.280000e+02 : f32
    %8 = vector.broadcast %cst_6 : f32 to vector<8x1xf32>
    %9 = arith.divf %7, %8 : vector<8x1xf32>
    %10 = vector.broadcast %9 : vector<8x1xf32> to vector<8x128xf32>
    %11 = arith.subf %5, %10 : vector<8x128xf32>
    %12 = arith.mulf %11, %11 : vector<8x128xf32>
    %cst_7 = arith.constant dense<0.000000e+00> : vector<8xf32>
    %13 = vector.multi_reduction <add>, %12, %cst_7 [1] : vector<8x128xf32> to vector<8xf32>
    %14 = vector.shape_cast %13 : vector<8xf32> to vector<8x1xf32>
    %cst_8 = arith.constant 1.280000e+02 : f32
    %15 = vector.broadcast %cst_8 : f32 to vector<8x1xf32>
    %16 = arith.divf %14, %15 : vector<8x1xf32>
    %17 = vector.broadcast %9 : vector<8x1xf32> to vector<8x128xf32>
    %18 = arith.subf %5, %17 : vector<8x128xf32>
    %cst_9 = arith.constant 9.99999996E-13 : f32
    %19 = vector.broadcast %cst_9 : f32 to vector<8x1xf32>
    %20 = arith.addf %16, %19 : vector<8x1xf32>
    %21 = math.rsqrt %20 : vector<8x1xf32>
    %22 = vector.broadcast %21 : vector<8x1xf32> to vector<8x128xf32>
    %23 = arith.mulf %18, %22 : vector<8x128xf32>
    %c1 = arith.constant 1 : index
    %c0_10 = arith.constant 0 : index
    %24 = vector.load %arg2[%c1, %c0_10] : memref<8x256xf32, #tpu.memory_space<vmem>>, vector<1x128xf32>
    %25 = vector.broadcast %24 : vector<1x128xf32> to vector<8x128xf32>
    %26 = arith.mulf %23, %25 : vector<8x128xf32>
    %c2 = arith.constant 2 : index
    %c0_11 = arith.constant 0 : index
    %27 = vector.load %arg2[%c2, %c0_11] : memref<8x256xf32, #tpu.memory_space<vmem>>, vector<1x128xf32>
    %28 = vector.broadcast %27 : vector<1x128xf32> to vector<8x128xf32>
    %29 = arith.addf %26, %28 : vector<8x128xf32>
    %c0_12 = arith.constant 0 : index
    %c0_13 = arith.constant 0 : index
    %30 = vector.load %arg3[%c0_12, %c0_13] : memref<128x256xf32, #tpu.memory_space<vmem>>, vector<128x256xf32>
    %cst_14 = arith.constant dense<0.000000e+00> : vector<8x256xf32>
    %31 = tpu.matmul %29, %30, %cst_14 {dimension_numbers = #tpu.dot_dimension_numbers<[1], [0], [0], [1], [0, 0, 1, 1], [], []>} : vector<8x128xf32>, vector<128x256xf32>, vector<8x256xf32> -> vector<8x256xf32>
    %c3 = arith.constant 3 : index
    %c0_15 = arith.constant 0 : index
    %32 = vector.load %arg2[%c3, %c0_15] : memref<8x256xf32, #tpu.memory_space<vmem>>, vector<1x256xf32>
    %33 = vector.broadcast %32 : vector<1x256xf32> to vector<8x256xf32>
    %34 = arith.addf %31, %33 : vector<8x256xf32>
    %35 = math.cos %34 : vector<8x256xf32>
    %cst_16 = arith.constant 1.000000e+00 : f32
    %36 = vector.broadcast %cst_16 : f32 to vector<8x256xf32>
    %37 = arith.mulf %35, %36 : vector<8x256xf32>
    %c0_17 = arith.constant 0 : index
    %c0_18 = arith.constant 0 : index
    %38 = vector.load %arg7[%c0_17, %c0_18] : memref<8x256xf32, #tpu.memory_space<vmem>>, vector<8x256xf32>
    tpu.vector_store %arg7[%c0_17, %c0_18], %37 {strides = array<i32>} : memref<8x256xf32, #tpu.memory_space<vmem>>, vector<8x256xf32>,
    %c0_19 = arith.constant 0 : index
    %c0_20 = arith.constant 0 : index
    %39 = vector.load %arg4[%c0_19, %c0_20] : memref<256x128xf32, #tpu.memory_space<vmem>>, vector<256x128xf32>
    %cst_21 = arith.constant dense<0.000000e+00> : vector<8x128xf32>
    %40 = tpu.matmul %37, %39, %cst_21 {dimension_numbers = #tpu.dot_dimension_numbers<[1], [0], [0], [1], [0, 0, 1, 1], [], []>} : vector<8x256xf32>, vector<256x128xf32>, vector<8x128xf32> -> vector<8x128xf32>
    %c4 = arith.constant 4 : index
    %c0_22 = arith.constant 0 : index
    %41 = vector.load %arg2[%c4, %c0_22] : memref<8x256xf32, #tpu.memory_space<vmem>>, vector<1x128xf32>
    %42 = vector.broadcast %41 : vector<1x128xf32> to vector<8x128xf32>
    %43 = arith.addf %40, %42 : vector<8x128xf32>
    %c0_23 = arith.constant 0 : index
    %c0_24 = arith.constant 0 : index
    %44 = vector.load %arg6[%c0_23, %c0_24] : memref<8x128xf32, #tpu.memory_space<vmem>>, vector<8x128xf32>
    tpu.vector_store %arg6[%c0_23, %c0_24], %43 {strides = array<i32>} : memref<8x128xf32, #tpu.memory_space<vmem>>, vector<8x128xf32>,
    %cst_25 = arith.constant dense<0.000000e+00> : vector<256x256xf32>
    %45 = tpu.matmul %37, %37, %cst_25 {dimension_numbers = #tpu.dot_dimension_numbers<[0], [0], [1], [1], [0, 1, 1, 1], [], []>} : vector<8x256xf32>, vector<8x256xf32>, vector<256x256xf32> -> vector<256x256xf32>
    %c0_26 = arith.constant 0 : index
    %c0_27 = arith.constant 0 : index
    %46 = vector.load %arg5[%c0_26, %c0_27] : memref<256x256xf32, #tpu.memory_space<vmem>>, vector<256x256xf32>
    %cst_28 = arith.constant 9.990000e-01 : f32
    %47 = vector.broadcast %cst_28 : f32 to vector<256x256xf32>
    %48 = arith.mulf %47, %46 : vector<256x256xf32>
    %cst_29 = arith.constant 1.250000e-04 : f32
    %49 = vector.broadcast %cst_29 : f32 to vector<256x256xf32>
    %50 = arith.mulf %49, %45 : vector<256x256xf32>
    %51 = arith.addf %48, %50 : vector<256x256xf32>
    %c0_30 = arith.constant 0 : index
    %c0_31 = arith.constant 0 : index
    %52 = vector.load %arg8[%c0_30, %c0_31] : memref<256x256xf32, #tpu.memory_space<vmem>>, vector<256x256xf32>
    tpu.vector_store %arg8[%c0_30, %c0_31], %51 {strides = array<i32>} : memref<256x256xf32, #tpu.memory_space<vmem>>, vector<256x256xf32>,
    return
  }
}

</mosaic_0001>

<bundles_post_ra>
// kernel: sngp_forward.1
= control target key start
LH: loop header
LB: loop body
LE: loop exit
PB: predicated region body
PF: predicated region fallthrough
CT: control target
= control target key end

     0   :  { %14 = vsyncpa [#allocation3], 0  ;;  %s2153_s0 = inlined_call_operand.vmem [shape: f32[8,128], index: 0, kind: input, shape index: {}]   ;;  %s2154_s1 = inlined_call_operand.hbm [shape: f32[128,128], index: 1, kind: input, shape index: {}]   ;;  %s2155_s2 = inlined_call_operand.vmem [shape: f32[8,256], index: 2, kind: input, shape index: {}]   ;;  %s2156_s3 = inlined_call_operand.hbm [shape: f32[128,256], index: 3, kind: input, shape index: {}]   ;;  %s2157_s4 = inlined_call_operand.hbm [shape: f32[256,128], index: 4, kind: input, shape index: {}]   ;;  %s2158_s5 = inlined_call_operand.hbm [shape: f32[256,256], index: 5, kind: input, shape index: {}, may-alias: {5,8}]   ;;  %s2159_s6 = inlined_call_operand.hbm [shape: f32[8,128], index: 6, kind: output, shape index: {0}]   ;;  %s2160_s7 = inlined_call_operand.hbm [shape: f32[8,256], index: 7, kind: output, shape index: {1}]   ;;  %s2161_s8 = inlined_call_operand.hbm [shape: f32[256,256], index: 8, kind: output, shape index: {2}, may-alias: {5,8}]  }
   0x1   :  { %15 = vsyncpa [#allocation6], 0 }
   0x2   :  { %16 = vsyncpa [#allocation9], 0 }
   0x3   :  { %17 = vsyncpa [#allocation4], 0 }
   0x4   :  { %18 = vsyncpa [#allocation12], 0  ;;  %s1819_s27 = smov [#allocation5]   ;;  %s1655_s9 = scalar_lea.hbm %s2156_s3, 4096 }
   0x5   :  { %s40_s28 = sshll.u32 %s1819_s27, 4  ;;  %p1656_p0 = scmp.ne.s32.totalorder %s2156_s3, %s1655_s9  ;;  %s41_s28 = int_to_ptr.vmem [resolvable:$true] %s40_s28 }
   0x6   :  { %p1659_p1 = scmp.lt.u32.totalorder %s1655_s9, %s2156_s3 }
   0x8   :  { %p1661_p2 = pnand %p1659_p1, %p1656_p0 }
   0xa   :  { %1664 = shalt.err (!%p1661_p2)
}
   0xb   :  { %s1665_s14 = scalar_lea.vmem %s41_s28, 4096  ;;  %p1670_p4 = scmp.lt.s32.totalorder %s41_s28, %s41_s28 }
   0xc   :  { %p1666_p3 = scmp.ne.s32.totalorder %s41_s28, %s1665_s14  ;;  %p1671_p5 = scmp.lt.s32.totalorder %s1665_s14, %s1665_s14 }
   0xe   :  { %p1672_p6 = por %p1671_p5, %p1670_p4 }
  0x10   :  { %p1673_p7 = pnand %p1672_p6, %p1666_p3 }
  0x12   :  { %1676 = shalt.err (!%p1673_p7)
}
  0x13   :  { %s1820_s15 = smov 256   ;;  %s1821_s16 = smov 16  }
  0x14   :  { %46 = dma.hbm_to_vmem [thread:$0]  %s2156_s3, 4096, %s41_s28, [#allocation6], %s1820_s15, %s1820_s15, %s1821_s16  }
  0x15   :  { %s1822_s19 = smov [#allocation2]   ;;  %s1677_s23 = scalar_lea.hbm %s2154_s1, 2048 }
  0x16   :  { %s26_s20 = sshll.u32 %s1822_s19, 4  ;;  %p1678_p8 = scmp.ne.s32.totalorder %s2154_s1, %s1677_s23  ;;  %s27_s20 = int_to_ptr.vmem [resolvable:$true] %s26_s20 }
  0x17   :  { %p1681_p9 = scmp.lt.u32.totalorder %s1677_s23, %s2154_s1 }
  0x19   :  { %p1683_p10 = pnand %p1681_p9, %p1678_p8 }
  0x1b   :  { %1686 = shalt.err (!%p1683_p10)
}
  0x1c   :  { %s1687_s29 = scalar_lea.vmem %s27_s20, 2048  ;;  %p1692_p12 = scmp.lt.s32.totalorder %s27_s20, %s27_s20 }
  0x1d   :  { %p1688_p11 = scmp.ne.s32.totalorder %s27_s20, %s1687_s29  ;;  %p1693_p13 = scmp.lt.s32.totalorder %s1687_s29, %s1687_s29 }
  0x1f   :  { %p1694_p0 = por %p1693_p13, %p1692_p12 }
  0x21   :  { %p1695_p1 = pnand %p1694_p0, %p1688_p11 }
  0x23   :  { %1698 = shalt.err (!%p1695_p1)
}
  0x24   :  { %s1823_s3 = smov 128   ;;  %s1824_s28 = smov 8  }
  0x25   :  { %32 = dma.hbm_to_vmem [thread:$0]  %s2154_s1, 2048, %s27_s20, [#allocation3], %s1823_s3, %s1823_s3, %s1824_s28  }
  0x26   :  { %s1825_s10 = smov [#allocation7]   ;;  %s1826_s12 = smov [#allocation8]  }
  0x27   :  { %s52_s11 = sshll.u32 %s1825_s10, 4  ;;  %s64_s13 = sshll.u32 %s1826_s12, 4  ;;  %s53_s11 = int_to_ptr.vmem [resolvable:$true] %s52_s11  ;;  %s1911_s13 = int_to_ptr.vmem [resolvable:$true] %s64_s13 }
  0x28   :  { %s1699_s18 = scalar_lea.hbm %s2157_s4, 4096 }
  0x29   :  { %p1700_p2 = scmp.ne.s32.totalorder %s2157_s4, %s1699_s18  ;;  %p1703_p3 = scmp.lt.u32.totalorder %s1699_s18, %s2157_s4 }
  0x2b   :  { %p1705_p4 = pnand %p1703_p3, %p1700_p2 }
  0x2d   :  { %1708 = shalt.err (!%p1705_p4)
}
  0x2e   :  { %s1709_s1 = scalar_lea.vmem %s53_s11, 4096  ;;  %p1714_p6 = scmp.lt.s32.totalorder %s53_s11, %s53_s11 }
  0x2f   :  { %p1710_p5 = scmp.ne.s32.totalorder %s53_s11, %s1709_s1  ;;  %p1715_p7 = scmp.lt.s32.totalorder %s1709_s1, %s1709_s1 }
  0x31   :  { %p1716_p8 = por %p1715_p7, %p1714_p6 }
  0x33   :  { %p1717_p9 = pnand %p1716_p8, %p1710_p5 }
  0x35   :  { %1720 = shalt.err (!%p1717_p9)
}
  0x36   :  { %58 = dma.hbm_to_vmem [thread:$0]  %s2157_s4, 4096, %s53_s11, [#allocation6], %s1823_s3, %s1823_s3, %s1824_s28  }
  0x37   :  { %s1721_s27 = scalar_lea.hbm %s2158_s5, 8192 }
  0x38   :  { %p1722_p10 = scmp.ne.s32.totalorder %s2158_s5, %s1721_s27  ;;  %p1725_p11 = scmp.lt.u32.totalorder %s1721_s27, %s2158_s5 }
  0x3a   :  { %p1727_p12 = pnand %p1725_p11, %p1722_p10 }
  0x3c   :  { %1730 = shalt.err (!%p1727_p12)
}
  0x3d   :  { %s1731_s12 = scalar_lea.vmem %s1911_s13, 8192  ;;  %p1736_p0 = scmp.lt.s32.totalorder %s1911_s13, %s1911_s13 }
  0x3e   :  { %p1732_p13 = scmp.ne.s32.totalorder %s1911_s13, %s1731_s12  ;;  %p1737_p1 = scmp.lt.s32.totalorder %s1731_s12, %s1731_s12 }
  0x40   :  { %p1738_p2 = por %p1737_p1, %p1736_p0 }
  0x42   :  { %p1739_p3 = pnand %p1738_p2, %p1732_p13 }
  0x44   :  { %1742 = shalt.err (!%p1739_p3)
}
  0x45   :  { %70 = dma.hbm_to_vmem [thread:$0]  %s2158_s5, 8192, %s1911_s13, [#allocation9], %s1820_s15, %s1820_s15, %s1821_s16  }
  0x46   :  { %1809 = dma.done.wait [#allocation3], 2048  }
  0x47   :  { %1810 = vsyncadd [#allocation3], 4294965248 }
  0x48   :  { %1811 = dma.done.wait [#allocation6], 8192  }
  0x49   :  { %1812 = vsyncadd [#allocation6], 4294959104 }
  0x4a   :  { %1813 = dma.done.wait [#allocation9], 8192  }
  0x4b   :  { %1814 = vsyncadd [#allocation9], 4294959104  ;;  %v1827_v0 = vmov 0.0|0.0   ;;  %vm1828_vm0 = vmmov 0   ;;  %v1829_v1 = vmov 0.0   ;;  %v84_v2 = vld [vmem:[#allocation2] sm:$0xff] }
  0x4c   :  { %1527 = vmatprep.subr.bf16.mxu0 %v1827_v0  ;;  %1524 = vmatprep.mubr.msk.f32.mxu0 %vm1828_vm0, %v1829_v1  ;;  %v85_v3 = vld [vmem:[#allocation2 + $0x8] sm:$0xff]  ;;  %v86_v4 = vld [vmem:[#allocation2 + $0x10] sm:$0xff]  ;;  %v87_v6 = vld [vmem:[#allocation2 + $0x18] sm:$0xff]  ;;  %s1837_s20 = smov [#allocation10]  }
  0x4d   :  { %296 = vmatprep.mubr.f32.mxu1 %v1829_v1  ;;  %v1528_v5 = vpack.c.bf16 %v85_v3, %v84_v2  ;;  %v1531_v7 = vpack.c.bf16 %v87_v6, %v86_v4  ;;  %v88_v8 = vld [vmem:[#allocation2 + $0x20] sm:$0xff]  ;;  %v89_v9 = vld [vmem:[#allocation2 + $0x28] sm:$0xff]  ;;  %v90_v11 = vld [vmem:[#allocation2 + $0x30] sm:$0xff]  ;;  %s1359_s24 = sshll.u32 %s1837_s20, 4  ;;  %s2107_s24 = int_to_ptr.vmem [resolvable:$true] %s1359_s24 }
  0x4e   :  { %v1534_v10 = vpack.c.bf16 %v89_v9, %v88_v8  ;;  %v91_v12 = vld [vmem:[#allocation2 + $0x38] sm:$0xff]  ;;  %v92_v14 = vld [vmem:[#allocation2 + $0x40] sm:$0xff]  ;;  %v93_v15 = vld [vmem:[#allocation2 + $0x48] sm:$0xff] }
  0x4f   :  { %1529 = vmatpush3.bf16.msra.mxu0 %v1528_v5  ;;  %v1537_v13 = vpack.c.bf16 %v91_v12, %v90_v11  ;;  %v1540_v16 = vpack.c.bf16 %v93_v15, %v92_v14  ;;  %v94_v17 = vld [vmem:[#allocation2 + $0x50] sm:$0xff]  ;;  %v95_v18 = vld [vmem:[#allocation2 + $0x58] sm:$0xff]  ;;  %v96_v20 = vld [vmem:[#allocation2 + $0x60] sm:$0xff] }
  0x50   :  { %1530 = vmatprep.subr.bf16.mxu0 %v1827_v0  ;;  %v1543_v19 = vpack.c.bf16 %v95_v18, %v94_v17  ;;  %v97_v21 = vld [vmem:[#allocation2 + $0x68] sm:$0xff]  ;;  %v98_v23 = vld [vmem:[#allocation2 + $0x70] sm:$0xff]  ;;  %v99_v24 = vld [vmem:[#allocation2 + $0x78] sm:$0xff] }
  0x51   :  { %v1546_v22 = vpack.c.bf16 %v97_v21, %v96_v20  ;;  %v1549_v25 = vpack.c.bf16 %v99_v24, %v98_v23  ;;  %v83_v26 = vld [vmem:[%s2153_s0] sm:$0xff]  ;;  %v188_v31 = vld [vmem:[#allocation5 + $0x8] sm:$0xff]  ;;  %v190_v32 = vld [vmem:[#allocation5 + $0x18] sm:$0xff] }
  0x52   :  { %v100_v27 = vld [vmem:[%s2155_s2] ss:$0 sm:$0xff]  ;;  %v1551_v34 = vpack.c.bf16 %v190_v32, %v188_v31  ;;  %v189_v35 = vld [vmem:[#allocation5 + $0x10] sm:$0xff]  ;;  %v192_v36 = vld [vmem:[#allocation5 + $0x28] sm:$0xff] }
  0x53   :  { %1532 = vmatpush3.bf16.msra.mxu0 %v1531_v7  ;;  %v187_v33 = vld [vmem:[#allocation5] sm:$0xff]  ;;  %v194_v37 = vld [vmem:[#allocation5 + $0x38] sm:$0xff]  ;;  %v193_v41 = vld [vmem:[#allocation5 + $0x30] sm:$0xff] }
  0x54   :  { %1533 = vmatprep.subr.bf16.mxu0 %v1827_v0  ;;  %v1553_v38 = vpack.c.bf16 %v189_v35, %v187_v33  ;;  %v1555_v39 = vpack.c.bf16 %v194_v37, %v192_v36  ;;  %v191_v40 = vld [vmem:[#allocation5 + $0x20] sm:$0xff]  ;;  %v196_v42 = vld [vmem:[#allocation5 + $0x48] sm:$0xff]  ;;  %1552 = vmatprep.subr.bf16.mxu1 %v1551_v34  ;;  %v198_v43 = vld [vmem:[#allocation5 + $0x58] sm:$0xff] }
  0x55   :  { %v1557_v44 = vpack.c.bf16 %v193_v41, %v191_v40  ;;  %v1559_v45 = vpack.c.bf16 %v198_v43, %v196_v42  ;;  %v195_v46 = vld [vmem:[#allocation5 + $0x40] sm:$0xff]  ;;  %v197_v47 = vld [vmem:[#allocation5 + $0x50] sm:$0xff]  ;;  %v200_v53 = vld [vmem:[#allocation5 + $0x68] sm:$0xff] }
  0x56   :  { %1554 = vmatpush1.bf16.msra.mxu1 %v1553_v38  ;;  %v1561_v48 = vpack.c.bf16 %v197_v47, %v195_v46  ;;  %v202_v54 = vld [vmem:[#allocation5 + $0x78] sm:$0xff]  ;;  %v199_v56 = vld [vmem:[#allocation5 + $0x60] sm:$0xff]  ;;  %v201_v57 = vld [vmem:[#allocation5 + $0x70] sm:$0xff] }
  0x57   :  { %1535 = vmatpush3.bf16.msra.mxu0 %v1534_v10  ;;  %1556 = vmatprep.subr.bf16.mxu1 %v1555_v39  ;;  %v1563_v55 = vpack.c.bf16 %v202_v54, %v200_v53  ;;  %v1565_v58 = vpack.c.bf16 %v201_v57, %v199_v56  ;;  %v204_v59 = vld [vmem:[#allocation5 + $0x88] sm:$0xff]  ;;  %v206_v60 = vld [vmem:[#allocation5 + $0x98] sm:$0xff]  ;;  %v203_v62 = vld [vmem:[#allocation5 + $0x80] sm:$0xff] }
  0x58   :  { %1536 = vmatprep.subr.bf16.mxu0 %v1827_v0  ;;  %v1567_v61 = vpack.c.bf16 %v206_v60, %v204_v59  ;;  %v205_v63 = vld [vmem:[#allocation5 + $0x90] sm:$0xff]  ;;  %v208_v2 = vld [vmem:[#allocation5 + $0xa8] sm:$0xff]  ;;  %v210_v3 = vld [vmem:[#allocation5 + $0xb8] sm:$0xff] }
  0x59   :  { %v207_v4 = vld [vmem:[#allocation5 + $0xa0] sm:$0xff]  ;;  %v1571_v5 = vpack.c.bf16 %v210_v3, %v208_v2  ;;  %v209_v6 = vld [vmem:[#allocation5 + $0xb0] sm:$0xff]  ;;  %v212_v7 = vld [vmem:[#allocation5 + $0xc8] sm:$0xff] }
  0x5a   :  { %1558 = vmatpush1.bf16.msra.mxu1 %v1557_v44  ;;  %v214_v8 = vld [vmem:[#allocation5 + $0xd8] sm:$0xff]  ;;  %v1573_v9 = vpack.c.bf16 %v209_v6, %v207_v4  ;;  %v211_v11 = vld [vmem:[#allocation5 + $0xc0] sm:$0xff]  ;;  %v213_v12 = vld [vmem:[#allocation5 + $0xd0] sm:$0xff] }
  0x5b   :  { %1538 = vmatpush3.bf16.msra.mxu0 %v1537_v13  ;;  %1560 = vmatprep.subr.bf16.mxu1 %v1559_v45  ;;  %v1575_v10 = vpack.c.bf16 %v214_v8, %v212_v7  ;;  %v216_v13 = vld [vmem:[#allocation5 + $0xe8] sm:$0xff]  ;;  %v218_v14 = vld [vmem:[#allocation5 + $0xf8] sm:$0xff]  ;;  %v1577_v15 = vpack.c.bf16 %v213_v12, %v211_v11  ;;  %v215_v17 = vld [vmem:[#allocation5 + $0xe0] sm:$0xff] }
  0x5c   :  { %1539 = vmatprep.subr.bf16.mxu0 %v1827_v0  ;;  %v217_v18 = vld [vmem:[#allocation5 + $0xf0] sm:$0xff]  ;;  %v183_v24 = vld [vmem:[%s2155_s2 + $0x1] ss:$0 sm:$0xff]  ;;  %v512_v33 = vld [vmem:[#allocation7 + $0x8] sm:$0xff] }
  0x5d   :  { %v511_v32 = vld [vmem:[#allocation7] sm:$0xff]  ;;  %v529_v35 = vld [vmem:[#allocation7 + $0x90] sm:$0xff]  ;;  %v530_v36 = vld [vmem:[#allocation7 + $0x98] sm:$0xff] }
  0x5e   :  { %1562 = vmatpush1.bf16.msra.mxu1 %v1561_v48  ;;  %v1585_v34 = vpack.c.bf16 %v512_v33, %v511_v32  ;;  %v1587_v37 = vpack.c.bf16 %v530_v36, %v529_v35  ;;  %v513_v38 = vld [vmem:[#allocation7 + $0x10] sm:$0xff]  ;;  %v514_v39 = vld [vmem:[#allocation7 + $0x18] sm:$0xff]  ;;  %v531_v41 = vld [vmem:[#allocation7 + $0xa0] sm:$0xff] }
  0x5f   :  { %1541 = vmatpush3.bf16.msra.mxu0 %v1540_v16  ;;  %1564 = vmatprep.subr.bf16.mxu1 %v1563_v55  ;;  %v1579_v16 = vpack.c.bf16 %v218_v14, %v216_v13  ;;  %v1589_v40 = vpack.c.bf16 %v514_v39, %v513_v38  ;;  %v532_v42 = vld [vmem:[#allocation7 + $0xa8] sm:$0xff]  ;;  %v515_v44 = vld [vmem:[#allocation7 + $0x20] sm:$0xff]  ;;  %v533_v47 = vld [vmem:[#allocation7 + $0xb0] sm:$0xff]  ;;  %v222_v14 = vlaneseq }
  0x60   :  { %1542 = vmatprep.subr.bf16.mxu0 %v1827_v0  ;;  %v1591_v43 = vpack.c.bf16 %v532_v42, %v531_v41  ;;  %v516_v45 = vld [vmem:[#allocation7 + $0x28] sm:$0xff]  ;;  %v534_v48 = vld [vmem:[#allocation7 + $0xb8] sm:$0xff]  ;;  %v535_v53 = vld [vmem:[#allocation7 + $0xc0] sm:$0xff] }
  0x61   :  { %v1593_v46 = vpack.c.bf16 %v516_v45, %v515_v44  ;;  %v536_v54 = vld [vmem:[#allocation7 + $0xc8] sm:$0xff]  ;;  %v519_v55 = vld [vmem:[#allocation7 + $0x40] sm:$0xff]  ;;  %v538_v59 = vld [vmem:[#allocation7 + $0xd8] sm:$0xff]  ;;  %v1830_v45 = vmov 683565275  }
  0x62   :  { %1566 = vmatpush1.bf16.msra.mxu1 %v1565_v58  ;;  %v1599_v56 = vpack.c.bf16 %v536_v54, %v535_v53  ;;  %v520_v57 = vld [vmem:[#allocation7 + $0x48] sm:$0xff]  ;;  %v537_v58 = vld [vmem:[#allocation7 + $0xd0] sm:$0xff]  ;;  %v542_v8 = vld [vmem:[#allocation7 + $0xf8] sm:$0xff]  ;;  %v1833_v53 = vmov 2102212464  }
  0x63   :  { %1544 = vmatpush3.bf16.msra.mxu0 %v1543_v19  ;;  %1568 = vmatprep.subr.bf16.mxu1 %v1567_v61  ;;  %v1581_v19 = vpack.c.bf16 %v217_v18, %v215_v17  ;;  %v1601_v60 = vpack.c.bf16 %v520_v57, %v519_v55  ;;  %v1603_v61 = vpack.c.bf16 %v538_v59, %v537_v58  ;;  %v540_v2 = vld [vmem:[#allocation7 + $0xe8] sm:$0xff]  ;;  %v541_v7 = vld [vmem:[#allocation7 + $0xf0] sm:$0xff]  ;;  %v526_v12 = vld [vmem:[#allocation7 + $0x78] sm:$0xff]  ;;  %v1834_v55 = vmov 920167782  }
  0x64   :  { %1545 = vmatprep.subr.bf16.mxu0 %v1827_v0  ;;  %v524_v6 = vld [vmem:[#allocation7 + $0x68] sm:$0xff]  ;;  %v525_v11 = vld [vmem:[#allocation7 + $0x70] sm:$0xff] }
  0x65   :  { %v1613_v13 = vpack.c.bf16 %v526_v12, %v525_v11  ;;  %v1399_v17 = vld [vmem:[%s2155_s2 + $0x3] ss:$8 sm:$0x3] }
  0x67   :  { %1547 = vmatpush3.bf16.msra.mxu0 %v1546_v22 }
  0x68   :  { %1548 = vmatprep.subr.bf16.mxu0 %v1827_v0  ;;  %v1569_v0 = vpack.c.bf16 %v205_v63, %v203_v62  ;;  %v521_v62 = vld [vmem:[#allocation7 + $0x50] sm:$0xff]  ;;  %v522_v63 = vld [vmem:[#allocation7 + $0x58] sm:$0xff] }
  0x69   :  { %v1605_v3 = vpack.c.bf16 %v522_v63, %v521_v62  ;;  %v1835_v62 = vmov 1326507024  }
  0x6a   :  { %1570 = vmatpush1.bf16.msra.mxu1 %v1569_v0  ;;  %v539_v0 = vld [vmem:[#allocation7 + $0xe0] sm:$0xff] }
  0x6b   :  { %1550 = vmatpush3.bf16.msra.mxu0 %v1549_v25  ;;  %1572 = vmatprep.subr.bf16.mxu1 %v1571_v5  ;;  %v1607_v4 = vpack.c.bf16 %v540_v2, %v539_v0  ;;  %v523_v5 = vld [vmem:[#allocation7 + $0x60] sm:$0xff] }
  0x6e   :  { %1525 = vmatmul.mubr.f32.vlgmr.msra.gmra.mrb[0].mxu0 %v83_v26  ;;  %1574 = vmatpush1.bf16.msra.mxu1 %v1573_v9  ;;  %v185_v26 = vld [vmem:[%s2155_s2 + $0x2] ss:$0 sm:$0xff]  ;;  %v1609_v9 = vpack.c.bf16 %v524_v6, %v523_v5 }
  0x6f   :  { %1576 = vmatprep.subr.bf16.mxu1 %v1575_v10  ;;  %v1611_v10 = vpack.c.bf16 %v542_v8, %v541_v7 }
  0x72   :  { %1578 = vmatpush1.bf16.msra.mxu1 %v1577_v15  ;;  %v223_v15 = vshrl.u32 %v222_v14, 7 }
  0x73   :  { %1580 = vmatprep.subr.bf16.mxu1 %v1579_v16 }
  0x74   :  { %v224_v16 = vsub.s32 0, %v223_v15  ;;  %v228_v18 = vsub.s32 1, %v223_v15 }
  0x76   :  { %1582 = vmatpush1.bf16.msra.mxu1 %v1581_v19  ;;  %v225_v19 = vrot.slane %v1399_v17, %v224_v16 }
 0x141   :  { %v167_v28 = vpop.f32.mrb[0].mxu0 }
 0x142   :  { %v168_v29 = vadd.f32 %v167_v28, %v100_v27  ;;  %v1526_v30 = vpop.f32.mrb[1].mxu0 }
 0x143   :  { %v528_v30 = vld [vmem:[#allocation7 + $0x88] sm:$0xff] }
 0x144   :  { %171 = vadd.xlane.f32.xlu0 %v168_v29 }
 0x1d1   :  { %v172_v49 = vpop.xlane.xlu0 %171 }
 0x1d2   :  { %v174_v50 = vmul.f32 0.0078125, %v172_v49  ;;  %v1595_v49 = vpack.c.bf16 %v534_v48, %v533_v47 }
 0x1d4   :  { %v175_v51 = vsub.f32 %v168_v29, %v174_v50  ;;  %v527_v29 = vld [vmem:[#allocation7 + $0x80] sm:$0xff]  ;;  %v517_v50 = vld [vmem:[#allocation7 + $0x30] sm:$0xff] }
 0x1d5   :  { %v1583_v31 = vpack.c.bf16 %v528_v30, %v527_v29 }
 0x1d6   :  { %v176_v52 = vmul.f32 %v175_v51, %v175_v51 }
 0x1d7   :  { %1584 = vmatprep.subr.bf16.mxu0 %v1583_v31 }
 0x1d8   :  { %177 = vadd.xlane.f32.xlu0 %v176_v52  ;;  %1586 = vmatpush3.bf16.msra.mxu0 %v1585_v34 }
 0x1d9   :  { %1588 = vmatprep.subr.bf16.mxu0 %v1587_v37 }
 0x1dc   :  { %1590 = vmatpush3.bf16.msra.mxu0 %v1589_v40 }
 0x1dd   :  { %1592 = vmatprep.subr.bf16.mxu0 %v1591_v43 }
 0x1e0   :  { %1594 = vmatpush3.bf16.msra.mxu0 %v1593_v46 }
 0x1e1   :  { %1596 = vmatprep.subr.bf16.mxu0 %v1595_v49  ;;  %v1831_v49 = vmov 2475754826  }
 0x265   :  { %v178_v20 = vpop.xlane.xlu0 %177 }
 0x266   :  { %v179_v21 = vmul.f32 0.0078125, %v178_v20  ;;  %v229_v20 = vrot.slane %v1399_v17, %v228_v18 }
 0x268   :  { %v180_v22 = vadd.f32 1e-12, %v179_v21 }
 0x26a   :  { %1645 = vrsqrt.f32 %v180_v22 }
 0x274   :  { %v1646_v23 = vpop.eup %1645 }
 0x275   :  { %v182_v25 = vmul.f32 %v1646_v23, %v175_v51  ;;  %v518_v51 = vld [vmem:[#allocation7 + $0x38] sm:$0xff] }
 0x276   :  { %v1597_v52 = vpack.c.bf16 %v518_v51, %v517_v50  ;;  %v1832_v51 = vmov 2131351028  }
 0x277   :  { %v184_v27 = vmul.f32 %v183_v24, %v182_v25 }
 0x278   :  { %1598 = vmatpush3.bf16.msra.mxu0 %v1597_v52 }
 0x279   :  { %v186_v28 = vadd.f32 %v185_v26, %v184_v27  ;;  %1600 = vmatprep.subr.bf16.mxu0 %v1599_v56 }
 0x27b   :  { %297 = vmatmul.mubr.f32.vlgmr.msra.gmra.mrb[0].mxu1 %v186_v28 }
 0x27c   :  { %912 = vmatprep.mubr.f32.mxu1 %v1829_v1  ;;  %1602 = vmatpush3.bf16.msra.mxu0 %v1601_v60 }
 0x27d   :  { %1604 = vmatprep.subr.bf16.mxu0 %v1603_v61 }
 0x280   :  { %1606 = vmatpush3.bf16.msra.mxu0 %v1605_v3 }
 0x281   :  { %1608 = vmatprep.subr.bf16.mxu0 %v1607_v4 }
 0x284   :  { %1610 = vmatpush3.bf16.msra.mxu0 %v1609_v9 }
 0x285   :  { %1612 = vmatprep.subr.bf16.mxu0 %v1611_v10 }
 0x288   :  { %1614 = vmatpush3.bf16.msra.mxu0 %v1613_v13 }
 0x34e   :  { %v298_v21 = vpop.f32.mrb[0].mxu1 }
 0x34f   :  { %v1963_v22 = vadd.f32 %v298_v21, %v225_v19  ;;  %v300_v23 = vpop.f32.mrb[1].mxu1 }
 0x350   :  { %v1965_v24 = vadd.f32 %v300_v23, %v229_v20 }
 0x351   :  { %v303_v25 = vand.u32 2147483647, %v1963_v22  ;;  %v306_v26 = vand.u32 2139095040, %v1963_v22  ;;  %vm305_vm15 = vcmp.lt.s32.totalorder %v1963_v22, 0 }
 0x352   :  { %v409_v27 = vand.u32 2139095040, %v1965_v24  ;;  %v406_v30 = vand.u32 2147483647, %v1965_v24 }
 0x353   :  { %v307_v28 = vshrl.u32 %v306_v26, 23  ;;  %v310_v29 = vand.u32 8388607, %v303_v25  ;;  %vm2018_vm0 = vcmp.le.f32.partialorder %v303_v25, 0.7853982 }
 0x354   :  { %v410_v31 = vshrl.u32 %v409_v27, 23  ;;  %v1975_v36 = vand.u32 8388607, %v406_v30 }
 0x355   :  { %v1400_v32 = vadd.s32 4294967169, %v307_v28  ;;  %v311_v35 = vor.u32 8388608, %v310_v29 }
 0x356   :  { %v1404_v33 = vadd.s32 4294967169, %v410_v31  ;;  %v414_v43 = vor.u32 8388608, %v1975_v36 }
 0x357   :  { %v313_v34 = vadd.s32 1, %v1400_v32  ;;  %v1977_v42 = vshll.u32 %v311_v35, 8 }
 0x358   :  { %v416_v37 = vadd.s32 1, %v1404_v33 }
 0x359   :  { %vm314_vm1 = vcmp.gt.s32.totalorder %v313_v34, 0 }
 0x35a   :  { %v315_v38 = vsel %vm314_vm1, %v313_v34, 0  ;;  %vm417_vm2 = vcmp.gt.s32.totalorder %v416_v37, 0  ;;  %vm408_vm1 = vcmp.lt.s32.totalorder %v1965_v24, 0 }
 0x35b   :  { %v316_v39 = vshrl.u32 %v315_v38, 5  ;;  %v317_v40 = vand.u32 31, %v315_v38  ;;  %v418_v41 = vsel %vm417_vm2, %v416_v37, 0  ;;  %v454_v38 = vshll.u32 %v414_v43, 8 }
 0x35c   :  { %v1980_v47 = vshrl.u32 %v418_v41, 5  ;;  %v420_v48 = vand.u32 31, %v418_v41  ;;  %vm2030_vm2 = vcmp.le.f32.partialorder %v406_v30, 0.7853982 }
 0x35d   :  { %v318_v44 = vsub.s32 32, %v317_v40  ;;  %v320_v46 = vshll.u32 %v1830_v45, %v317_v40  ;;  %v323_v50 = vshll.u32 %v1831_v49, %v317_v40  ;;  %v326_v52 = vshll.u32 %v1832_v51, %v317_v40 }
 0x35e   :  { %v329_v54 = vshll.u32 %v1833_v53, %v317_v40  ;;  %v332_v56 = vshll.u32 %v1834_v55, %v317_v40  ;;  %vm335_vm3 = vcmp.lt.s32.totalorder %v316_v39, 1  ;;  %vm336_vm4 = vcmp.lt.s32.totalorder %v316_v39, 2 }
 0x35f   :  { %v321_v57 = vshrl.u32 %v1831_v49, %v318_v44  ;;  %v324_v58 = vshrl.u32 %v1832_v51, %v318_v44  ;;  %v327_v59 = vshrl.u32 %v1833_v53, %v318_v44  ;;  %v319_v60 = vshrl.u32 %v1830_v45, %v318_v44 }
 0x360   :  { %v330_v61 = vshrl.u32 %v1834_v55, %v318_v44  ;;  %v333_v63 = vshrl.u32 %v1835_v62, %v318_v44  ;;  %v421_v4 = vsub.s32 32, %v420_v48  ;;  %vm337_vm5 = vcmp.lt.s32.totalorder %v316_v39, 3 }
 0x361   :  { %v322_v0 = vor.u32 %v321_v57, %v320_v46  ;;  %v325_v2 = vor.u32 %v324_v58, %v323_v50  ;;  %v328_v3 = vor.u32 %v327_v59, %v326_v52  ;;  %vm338_vm6 = vcmp.lt.s32.totalorder %v316_v39, 4 }
 0x362   :  { %v331_v5 = vor.u32 %v330_v61, %v329_v54  ;;  %v334_v6 = vor.u32 %v333_v63, %v332_v56  ;;  %v423_v14 = vshll.u32 %v1830_v45, %v420_v48  ;;  %v424_v17 = vshrl.u32 %v1831_v49, %v421_v4 }
 0x363   :  { %v339_v7 = vsel %vm335_vm3, %v319_v60, %v322_v0  ;;  %v340_v8 = vsel %vm338_vm6, %v328_v3, 2102212464  ;;  %v343_v9 = vsel %vm335_vm3, %v322_v0, %v325_v2  ;;  %v347_v10 = vsel %vm335_vm3, %v325_v2, %v328_v3 }
 0x364   :  { %v341_v11 = vsel %vm337_vm5, %v325_v2, %v340_v8  ;;  %v344_v12 = vsel %vm338_vm6, %v331_v5, 920167782  ;;  %v348_v13 = vsel %vm338_vm6, %v334_v6, 1326507024  ;;  %v426_v18 = vshll.u32 %v1831_v49, %v420_v48 }
 0x365   :  { %v345_v15 = vsel %vm337_vm5, %v328_v3, %v344_v12  ;;  %v349_v16 = vsel %vm337_vm5, %v331_v5, %v348_v13  ;;  %v342_v19 = vsel %vm336_vm4, %v339_v7, %v341_v11  ;;  %v427_v23 = vshrl.u32 %v1832_v51, %v421_v4 }
 0x366   :  { %v346_v20 = vsel %vm336_vm4, %v343_v9, %v345_v15  ;;  %v350_v21 = vsel %vm336_vm4, %v347_v10, %v349_v16  ;;  %v425_v31 = vor.u32 %v424_v17, %v423_v14  ;;  %v429_v33 = vshll.u32 %v1832_v51, %v420_v48 }
 0x367   :  { %v1989_v26 = vmul.u32.u64.low %v1977_v42, %v350_v21  ;;  %v1990_v27 = vmul.u32.u64.high %v1977_v42, %v350_v21, %v1989_v26  ;;  %v1993_v28 = vmul.u32.u64.low %v1977_v42, %v346_v20  ;;  %v1994_v29 = vmul.u32.u64.high %v1977_v42, %v346_v20, %v1993_v28 }
 0x368   :  { %v428_v32 = vor.u32 %v427_v23, %v426_v18  ;;  %v430_v34 = vshrl.u32 %v1833_v53, %v421_v4  ;;  %v432_v35 = vshll.u32 %v1833_v53, %v420_v48  ;;  %v433_v36 = vshrl.u32 %v1834_v55, %v421_v4 }
 0x369   :  { %v436_v37 = vshrl.u32 %v1835_v62, %v421_v4  ;;  %v358_v39 = vmul.u32 %v1977_v42, %v342_v19  ;;  %v422_v40 = vshrl.u32 %v1830_v45, %v421_v4  ;;  %v435_v44 = vshll.u32 %v1834_v55, %v420_v48 }
 0x36a   :  { %v431_v41 = vor.u32 %v430_v34, %v429_v33  ;;  %vm360_vm7 = vc.u32 %v1990_v27, %v1993_v28  ;;  %v361_v46 = vadd.s32 1, %v1994_v29  ;;  %v434_v49 = vor.u32 %v433_v36, %v432_v35 }
 0x36b   :  { %vm438_vm8 = vcmp.lt.s32.totalorder %v1980_v47, 1  ;;  %v437_v50 = vor.u32 %v436_v37, %v435_v44  ;;  %vm440_vm9 = vcmp.lt.s32.totalorder %v1980_v47, 3  ;;  %vm441_vm10 = vcmp.lt.s32.totalorder %v1980_v47, 4 }
 0x36c   :  { %v446_v51 = vsel %vm438_vm8, %v425_v31, %v428_v32  ;;  %v362_v43 = vsel %vm360_vm7, %v361_v46, %v1994_v29  ;;  %v443_v52 = vsel %vm441_vm10, %v431_v41, 2102212464  ;;  %v447_v42 = vsel %vm441_vm10, %v434_v49, 920167782 }
 0x36d   :  { %v450_v45 = vsel %vm438_vm8, %v428_v32, %v431_v41  ;;  %v363_v53 = vadd.s32 %v362_v43, %v358_v39  ;;  %vm439_vm11 = vcmp.lt.s32.totalorder %v1980_v47, 2  ;;  %v448_v48 = vsel %vm440_vm9, %v431_v41, %v447_v42 }
 0x36e   :  { %v451_v54 = vsel %vm441_vm10, %v437_v50, 1326507024  ;;  %v442_v55 = vsel %vm438_vm8, %v422_v40, %v425_v31  ;;  %v444_v56 = vsel %vm440_vm9, %v428_v32, %v443_v52  ;;  %v449_v57 = vsel %vm439_vm11, %v446_v51, %v448_v48 }
 0x36f   :  { %v452_v58 = vsel %vm440_vm9, %v434_v49, %v451_v54  ;;  %v364_v59 = vadd.s32 536870912, %v363_v53  ;;  %v2004_v61 = vmul.u32.u64.low %v454_v38, %v449_v57  ;;  %v2005_v62 = vmul.u32.u64.high %v454_v38, %v449_v57, %v2004_v61 }
 0x370   :  { %v453_v60 = vsel %vm439_vm11, %v450_v45, %v452_v58  ;;  %v445_v3 = vsel %vm439_vm11, %v442_v55, %v444_v56  ;;  %v359_v19 = vadd.s32 %v1993_v28, %v1990_v27  ;;  %vm395_vm6 = vweird.f32 %v1963_v22 }
 0x371   :  { %v2007_v63 = vmul.u32.u64.low %v454_v38, %v453_v60  ;;  %v2008_v0 = vmul.u32.u64.high %v454_v38, %v453_v60, %v2007_v63  ;;  %v365_v2 = vshrl.u32 %v364_v59, 30  ;;  %v464_v5 = vadd.s32 1, %v2005_v62 }
 0x372   :  { %v461_v47 = vmul.u32 %v454_v38, %v445_v3  ;;  %vm498_vm10 = vweird.f32 %v1965_v24  ;;  %vm679_vm11 = vcmask 64512  }
 0x373   :  { %v366_v4 = vshll.u32 %v365_v2, 30  ;;  %vm463_vm12 = vc.u32 %v2008_v0, %v2004_v61  ;;  %v462_v40 = vadd.s32 %v2004_v61, %v2008_v0  ;;  %v389_v45 = vsub.s32 4, %v365_v2 }
 0x374   :  { %v465_v7 = vsel %vm463_vm12, %v464_v5, %v2005_v62 }
 0x375   :  { %v367_v6 = vsub.s32 %v363_v53, %v366_v4  ;;  %v466_v8 = vadd.s32 %v465_v7, %v461_v47  ;;  %v390_v56 = vsel %vm305_vm15, %v389_v45, %v365_v2 }
 0x376   :  { %v392_v25 = vsel %vm2018_vm0, 0, %v390_v56 }
 0x377   :  { %v369_v9 = vsub.s32 0, %v367_v6  ;;  %v467_v10 = vadd.s32 536870912, %v466_v8  ;;  %v396_v63 = vand.u32 3, %v392_v25  ;;  %v1034_v25 = vld [vmem:[#allocation8 + $0x8] sm:$0xff] }
 0x379   :  { %v1401_v11 = vmin.u32 %v369_v9, %v367_v6  ;;  %v468_v12 = vshrl.u32 %v467_v10, 30  ;;  %vm401_vm3 = vcmp.eq.s32.totalorder %v396_v63, 2  ;;  %vm398_vm4 = vcmp.eq.s32.totalorder %v396_v63, 0 }
 0x37a   :  { %vm397_vm5 = vcmp.lt.s32.totalorder %v396_v63, 2 }
 0x37b   :  { %v371_v13 = vclz %v1401_v11  ;;  %v469_v14 = vshll.u32 %v468_v12, 30  ;;  %v492_v61 = vsub.s32 4, %v468_v12 }
 0x37d   :  { %v1402_v15 = vadd.s32 4294967294, %v371_v13  ;;  %v470_v16 = vsub.s32 %v466_v8, %v469_v14  ;;  %v493_v4 = vsel %vm408_vm1, %v492_v61, %v468_v12  ;;  %v1098_v61 = vmul.f32 0.999, %v1034_v25 }
 0x37f   :  { %vm1403_vm13 = vcmp.lt.s32.totalorder %v1402_v15, 0  ;;  %v472_v18 = vsub.s32 0, %v470_v16 }
 0x380   :  { %v374_v17 = vsel %vm1403_vm13, 0, %v1402_v15 }
 0x381   :  { %v375_v20 = vsub.s32 32, %v374_v17  ;;  %v379_v21 = vsub.s32 4294967266, %v374_v17  ;;  %v1405_v23 = vmin.u32 %v472_v18, %v470_v16  ;;  %v376_v26 = vshll.u32 %v367_v6, %v374_v17 }
 0x382   :  { %v495_v6 = vsel %vm2030_vm2, 0, %v493_v4 }
 0x383   :  { %v377_v29 = vshrl.u32 %v359_v19, %v375_v20  ;;  %v380_v31 = vadd.s32 127, %v379_v21  ;;  %v474_v32 = vclz %v1405_v23  ;;  %v499_v9 = vand.u32 3, %v495_v6  ;;  %v1037_v6 = vld [vmem:[#allocation8 + $0x20] sm:$0xff] }
 0x385   :  { %v378_v33 = vor.u32 %v377_v29, %v376_v26  ;;  %v381_v34 = vshll.u32 %v380_v31, 23  ;;  %v1406_v35 = vadd.s32 4294967294, %v474_v32  ;;  %vm504_vm7 = vcmp.eq.s32.totalorder %v499_v9, 2 }
 0x386   :  { %vm501_vm8 = vcmp.eq.s32.totalorder %v499_v9, 0  ;;  %vm500_vm9 = vcmp.lt.s32.totalorder %v499_v9, 2  ;;  %v1038_v9 = vld [vmem:[#allocation8 + $0x28] sm:$0xff] }
 0x387   :  { %v382_v36 = vor.u32 4788187, %v381_v34  ;;  %vm1407_vm14 = vcmp.lt.s32.totalorder %v1406_v35, 0  ;;  %v385_v38 = vcvt.s32.f32 %v378_v33 }
 0x388   :  { %v477_v39 = vsel %vm1407_vm14, 0, %v1406_v35 }
 0x389   :  { %v383_v37 = vand.u32 2147483647, %v382_v36  ;;  %v478_v41 = vsub.s32 32, %v477_v39  ;;  %v482_v44 = vsub.s32 4294967266, %v477_v39  ;;  %v479_v28 = vshll.u32 %v470_v16, %v477_v39 }
 0x38b   :  { %v386_v27 = vmul.f32 %v385_v38, %v383_v37  ;;  %v480_v46 = vshrl.u32 %v462_v40, %v478_v41  ;;  %v483_v49 = vadd.s32 127, %v482_v44 }
 0x38d   :  { %v387_v50 = vxor.u32 2147483648, %v386_v27  ;;  %v481_v51 = vor.u32 %v480_v46, %v479_v28  ;;  %v484_v43 = vshll.u32 %v483_v49, 23 }
 0x38f   :  { %v388_v42 = vsel %vm305_vm15, %v387_v50, %v386_v27  ;;  %v485_v48 = vor.u32 4788187, %v484_v43  ;;  %v488_v55 = vcvt.s32.f32 %v481_v51  ;;  %v543_v50 = vld [vmem:[%s2155_s2 + $0x4] ss:$0 sm:$0xff]  ;;  %s1836_s2 = smov [#allocation11]  }
 0x390   :  { %v391_v53 = vsel %vm2018_vm0, %v1963_v22, %v388_v42  ;;  %s1369_s1 = sshll.u32 %s1836_s2, 4  ;;  %s1370_s1 = int_to_ptr.vmem [resolvable:$true] %s1369_s1 }
 0x391   :  { %1647 = vcosq.f32 %v391_v53  ;;  %v486_v54 = vand.u32 2147483647, %v485_v48  ;;  %s1743_s25 = scalar_lea.vmem %s1370_s1, 256  ;;  %p1748_p5 = scmp.lt.s32.totalorder %s1370_s1, %s1370_s1 }
 0x392   :  { %1649 = vsinq.f32 %v391_v53  ;;  %p1744_p4 = scmp.ne.s32.totalorder %s1370_s1, %s1743_s25  ;;  %p1749_p6 = scmp.lt.s32.totalorder %s1743_s25, %s1743_s25 }
 0x393   :  { %v489_v57 = vmul.f32 %v488_v55, %v486_v54 }
 0x394   :  { %p1750_p7 = por %p1749_p6, %p1748_p5 }
 0x395   :  { %v490_v58 = vxor.u32 2147483648, %v489_v57 }
 0x396   :  { %p1751_p8 = pnand %p1750_p7, %p1744_p4 }
 0x397   :  { %v491_v60 = vsel %vm408_vm1, %v490_v58, %v489_v57  ;;  %v1033_v58 = vld [vmem:[#allocation8] sm:$0xff] }
 0x398   :  { %v494_v62 = vsel %vm2030_vm2, %v1965_v24, %v491_v60  ;;  %v1097_v59 = vmul.f32 0.999, %v1033_v58 }
 0x399   :  { %1651 = vcosq.f32 %v494_v62 }
 0x39a   :  { %1653 = vsinq.f32 %v494_v62  ;;  %v1035_v62 = vld [vmem:[#allocation8 + $0x10] sm:$0xff] }
 0x39b   :  { %v1648_v0 = vpop.eup %1647 }
 0x39c   :  { %v1650_v2 = vpop.eup %1649  ;;  %v402_v3 = vxor.u32 2147483648, %v1648_v0 }
 0x39d   :  { %v399_v5 = vxor.u32 2147483648, %v1650_v2 }
 0x39e   :  { %v403_v30 = vsel %vm401_vm3, %v402_v3, %v1650_v2  ;;  %v1036_v2 = vld [vmem:[#allocation8 + $0x18] sm:$0xff] }
 0x39f   :  { %v400_v47 = vsel %vm398_vm4, %v1648_v0, %v399_v5  ;;  %v1099_v5 = vmul.f32 0.999, %v1035_v62 }
 0x3a0   :  { %v404_v7 = vsel %vm397_vm5, %v400_v47, %v403_v30  ;;  %v1100_v47 = vmul.f32 0.999, %v1036_v2 }
 0x3a1   :  { %v405_v8 = vsel %vm395_vm6, nan, %v404_v7 }
 0x3a2   :  { %615 = vxpose.xlu1.b32.start.end [1/1] (short) %v405_v8, 128  ;;  %509 = vst [vmem:[#allocation11] sm:$0xff] %v405_v8 }
 0x3a3   :  { %v1652_v10 = vpop.eup %1651 }
 0x3a4   :  { %v1654_v11 = vpop.eup %1653  ;;  %v505_v13 = vxor.u32 2147483648, %v1652_v10 }
 0x3a5   :  { %v502_v12 = vxor.u32 2147483648, %v1654_v11 }
 0x3a6   :  { %v506_v14 = vsel %vm504_vm7, %v505_v13, %v1654_v11 }
 0x3a7   :  { %v503_v15 = vsel %vm501_vm8, %v1652_v10, %v502_v12 }
 0x3a8   :  { %v507_v16 = vsel %vm500_vm9, %v503_v15, %v506_v14 }
 0x3a9   :  { %v508_v17 = vsel %vm498_vm10, nan, %v507_v16 }
 0x3aa   :  { %608 = vmatprep.mubr.f32.mxu0 %v508_v17  ;;  %510 = vst [vmem:[#allocation11 + $0x8] sm:$0xff] %v508_v17  ;;  %776 = vmatprep.subr.mxu0 %v508_v17 }
 0x3ab   :  { %1615 = vmatprep.subr.mxu1 %v508_v17  ;;  %609 = vmatmul.mubr.f32.vlgmr.msra.gmra.mrb[2].mxu0 %v405_v8 }
 0x3ac   :  { %777 = vmatpush1.msra.mxu0 %v405_v8  ;;  %1616 = vmatpush1.msra.mxu1 %v405_v8 }
 0x3ad   :  { %840 = vmatprep.mubr.f32.mxu0 %v1829_v1 }
 0x3df   :  { %647 = vxpose.xlu1.b32.start.end [1/1] (short) %v508_v17, 128 }
 0x422   :  { %v631_v22 = vpop.trf.xlu1 }
 0x423   :  { %1408 = vmatmul.mubr.msk.f32.vlgmr.msra.gmra.mrb[4].mxu0 %vm679_vm11, %v631_v22 }
 0x424   :  { %846 = vmatprep.mubr.f32.mxu0 %v1829_v1 }
 0x426   :  { %v632_v18 = vpop.trf.xlu1 }
 0x427   :  { %1409 = vmatmul.mubr.msk.f32.gmra.mrb[6].mxu0 %vm679_vm11, %v632_v18 }
 0x428   :  { %852 = vmatprep.mubr.f32.mxu0 %v1829_v1 }
 0x42a   :  { %v633_v24 = vpop.trf.xlu1 }
 0x42b   :  { %1410 = vmatmul.mubr.msk.f32.gmra.mrb[8].mxu0 %vm679_vm11, %v633_v24 }
 0x42c   :  { %858 = vmatprep.mubr.f32.mxu0 %v1829_v1 }
 0x42e   :  { %v634_v19 = vpop.trf.xlu1 }
 0x42f   :  { %1411 = vmatmul.mubr.msk.f32.gmra.mrb[10].mxu0 %vm679_vm11, %v634_v19 }
 0x430   :  { %864 = vmatprep.mubr.f32.mxu0 %v1829_v1 }
 0x432   :  { %v635_v20 = vpop.trf.xlu1 }
 0x433   :  { %1412 = vmatmul.mubr.msk.f32.gmra.mrb[12].mxu0 %vm679_vm11, %v635_v20 }
 0x434   :  { %870 = vmatprep.mubr.f32.mxu0 %v1829_v1 }
 0x436   :  { %v636_v21 = vpop.trf.xlu1 }
 0x437   :  { %1413 = vmatmul.mubr.msk.f32.gmra.mrb[14].mxu0 %vm679_vm11, %v636_v21 }
 0x438   :  { %876 = vmatprep.mubr.f32.mxu0 %v1829_v1 }
 0x43a   :  { %v637_v23 = vpop.trf.xlu1 }
 0x43b   :  { %1414 = vmatmul.mubr.msk.f32.gmra.mrb[16].mxu0 %vm679_vm11, %v637_v23 }
 0x43c   :  { %882 = vmatprep.mubr.f32.mxu0 %v1829_v1 }
 0x43e   :  { %v638_v26 = vpop.trf.xlu1 }
 0x43f   :  { %1415 = vmatmul.mubr.msk.f32.gmra.mrb[18].mxu0 %vm679_vm11, %v638_v26 }
 0x440   :  { %888 = vmatprep.mubr.f32.mxu0 %v1829_v1 }
 0x442   :  { %v639_v29 = vpop.trf.xlu1 }
 0x443   :  { %1416 = vmatmul.mubr.msk.f32.gmra.mrb[20].mxu0 %vm679_vm11, %v639_v29 }
 0x444   :  { %894 = vmatprep.mubr.f32.mxu0 %v1829_v1 }
 0x446   :  { %v640_v31 = vpop.trf.xlu1 }
 0x447   :  { %1417 = vmatmul.mubr.msk.f32.gmra.mrb[22].mxu0 %vm679_vm11, %v640_v31 }
 0x448   :  { %900 = vmatprep.mubr.f32.mxu0 %v1829_v1 }
 0x44a   :  { %v641_v32 = vpop.trf.xlu1 }
 0x44b   :  { %1418 = vmatmul.mubr.msk.f32.gmra.mrb[24].mxu0 %vm679_vm11, %v641_v32 }
 0x44c   :  { %906 = vmatprep.mubr.f32.mxu0 %v1829_v1 }
 0x44e   :  { %v642_v33 = vpop.trf.xlu1 }
 0x44f   :  { %1419 = vmatmul.mubr.msk.f32.gmra.mrb[26].mxu0 %vm679_vm11, %v642_v33 }
 0x452   :  { %v643_v34 = vpop.trf.xlu1 }
 0x453   :  { %1420 = vmatmul.mubr.msk.f32.vlgmr.msra.gmra.mrb[2].mxu1 %vm679_vm11, %v643_v34 }
 0x454   :  { %918 = vmatprep.mubr.f32.mxu1 %v1829_v1 }
 0x456   :  { %v644_v35 = vpop.trf.xlu1 }
 0x457   :  { %1421 = vmatmul.mubr.msk.f32.gmra.mrb[4].mxu1 %vm679_vm11, %v644_v35 }
 0x458   :  { %924 = vmatprep.mubr.f32.mxu1 %v1829_v1 }
 0x45a   :  { %v645_v36 = vpop.trf.xlu1 }
 0x45b   :  { %1422 = vmatmul.mubr.msk.f32.gmra.mrb[6].mxu1 %vm679_vm11, %v645_v36 }
 0x45c   :  { %930 = vmatprep.mubr.f32.mxu1 %v1829_v1 }
 0x45e   :  { %v646_v37 = vpop.trf.xlu1 }
 0x45f   :  { %1423 = vmatmul.mubr.msk.f32.gmra.mrb[8].mxu1 %vm679_vm11, %v646_v37 }
 0x460   :  { %936 = vmatprep.mubr.f32.mxu1 %v1829_v1 }
 0x462   :  { %v663_v38 = vpop.trf.xlu1 }
 0x463   :  { %1424 = vmatmul.mubr.msk.f32.gmra.mrb[10].mxu1 %vm679_vm11, %v663_v38 }
 0x464   :  { %942 = vmatprep.mubr.f32.mxu1 %v1829_v1 }
 0x466   :  { %v664_v39 = vpop.trf.xlu1 }
 0x467   :  { %1425 = vmatmul.mubr.msk.f32.gmra.mrb[12].mxu1 %vm679_vm11, %v664_v39 }
 0x468   :  { %948 = vmatprep.mubr.f32.mxu1 %v1829_v1 }
 0x46a   :  { %v665_v40 = vpop.trf.xlu1 }
 0x46b   :  { %1426 = vmatmul.mubr.msk.f32.gmra.mrb[14].mxu1 %vm679_vm11, %v665_v40 }
 0x46c   :  { %954 = vmatprep.mubr.f32.mxu1 %v1829_v1 }
 0x46e   :  { %v666_v41 = vpop.trf.xlu1 }
 0x46f   :  { %1427 = vmatmul.mubr.msk.f32.gmra.mrb[16].mxu1 %vm679_vm11, %v666_v41 }
 0x470   :  { %960 = vmatprep.mubr.f32.mxu1 %v1829_v1 }
 0x472   :  { %v667_v44 = vpop.trf.xlu1 }
 0x473   :  { %1428 = vmatmul.mubr.msk.f32.gmra.mrb[18].mxu1 %vm679_vm11, %v667_v44 }
 0x474   :  { %966 = vmatprep.mubr.f32.mxu1 %v1829_v1 }
 0x476   :  { %v668_v27 = vpop.trf.xlu1 }
 0x477   :  { %1429 = vmatmul.mubr.msk.f32.gmra.mrb[20].mxu1 %vm679_vm11, %v668_v27 }
 0x478   :  { %972 = vmatprep.mubr.f32.mxu1 %v1829_v1 }
 0x47a   :  { %v669_v28 = vpop.trf.xlu1 }
 0x47b   :  { %1430 = vmatmul.mubr.msk.f32.gmra.mrb[22].mxu1 %vm679_vm11, %v669_v28 }
 0x47c   :  { %978 = vmatprep.mubr.f32.mxu1 %v1829_v1 }
 0x47e   :  { %v670_v46 = vpop.trf.xlu1  ;;  %v1489_v49 = vpop.f32.mrb[2].mxu0 }
 0x47f   :  { %1431 = vmatmul.mubr.msk.f32.gmra.mrb[24].mxu1 %vm679_vm11, %v670_v46  ;;  %v1490_v51 = vpop.f32.mrb[3].mxu0 }
 0x480   :  { %984 = vmatprep.mubr.f32.mxu1 %v1829_v1  ;;  %v1491_v43 = vadd.f32 %v1490_v51, %v1489_v49 }
 0x482   :  { %v671_v52 = vpop.trf.xlu1  ;;  %v611_v42 = vadd.f32 %v1491_v43, %v543_v50 }
 0x483   :  { %1432 = vmatmul.mubr.msk.f32.gmra.mrb[26].mxu1 %vm679_vm11, %v671_v52 }
 0x484   :  { %990 = vmatprep.mubr.f32.mxu1 %v1829_v1  ;;  %614 = vst [vmem:[#allocation10] sm:$0xff] %v611_v42 }
 0x486   :  { %v672_v45 = vpop.trf.xlu1 }
 0x487   :  { %1433 = vmatmul.mubr.msk.f32.gmra.mrb[28].mxu1 %vm679_vm11, %v672_v45 }
 0x488   :  { %996 = vmatprep.mubr.f32.mxu1 %v1829_v1 }
 0x48a   :  { %v673_v53 = vpop.trf.xlu1 }
 0x48b   :  { %1434 = vmatmul.mubr.msk.f32.gmra.mrb[30].mxu1 %vm679_vm11, %v673_v53 }
 0x48c   :  { %1002 = vmatprep.mubr.f32.mxu1 %v1829_v1 }
 0x48e   :  { %v674_v48 = vpop.trf.xlu1 }
 0x48f   :  { %1435 = vmatmul.mubr.msk.f32.gmra.mrb[32].mxu1 %vm679_vm11, %v674_v48 }
 0x490   :  { %1008 = vmatprep.mubr.f32.mxu1 %v1829_v1 }
 0x492   :  { %v675_v54 = vpop.trf.xlu1 }
 0x493   :  { %1436 = vmatmul.mubr.msk.f32.gmra.mrb[34].mxu1 %vm679_vm11, %v675_v54 }
 0x494   :  { %1014 = vmatprep.mubr.f32.mxu1 %v1829_v1 }
 0x496   :  { %v676_v55 = vpop.trf.xlu1 }
 0x497   :  { %1437 = vmatmul.mubr.msk.f32.gmra.mrb[36].mxu1 %vm679_vm11, %v676_v55 }
 0x498   :  { %1020 = vmatprep.mubr.f32.mxu1 %v1829_v1 }
 0x49a   :  { %v677_v56 = vpop.trf.xlu1 }
 0x49b   :  { %1438 = vmatmul.mubr.msk.f32.gmra.mrb[38].mxu1 %vm679_vm11, %v677_v56 }
 0x49c   :  { %1026 = vmatprep.mubr.f32.mxu1 %v1829_v1 }
 0x49e   :  { %v678_v57 = vpop.trf.xlu1 }
 0x49f   :  { %1439 = vmatmul.mubr.msk.f32.gmra.mrb[40].mxu1 %vm679_vm11, %v678_v57 }
 0x4f6   :  { %v842_v60 = vpop.f32.mrb[4].mxu0 }
 0x4f7   :  { %v1161_v63 = vmul.f32 0.000125, %v842_v60  ;;  %v844_v0 = vpop.f32.mrb[5].mxu0 }
 0x4f8   :  { %v1162_v3 = vmul.f32 0.000125, %v844_v0 }
 0x4f9   :  { %v1225_v4 = vadd.f32 %v1161_v63, %v1097_v59 }
 0x4fa   :  { %v1226_v1 = vadd.f32 %v1162_v3, %v1098_v61  ;;  %v848_v30 = vpop.f32.mrb[6].mxu0 }
 0x4fb   :  { %1289 = vst [vmem:[#allocation13] sm:$0xff] %v1225_v4  ;;  %v1163_v7 = vmul.f32 0.000125, %v848_v30  ;;  %v850_v8 = vpop.f32.mrb[7].mxu0 }
 0x4fc   :  { %1754 = shalt.err (!%p1751_p8)
}
 0x4fd   :  { %s1755_s29 = scalar_lea.hbm %s2160_s7, 256 }
 0x4fe   :  { %p1756_p9 = scmp.ne.s32.totalorder %s2160_s7, %s1755_s29  ;;  %p1759_p10 = scmp.lt.u32.totalorder %s1755_s29, %s2160_s7 }
 0x500   :  { %p1761_p11 = pnand %p1759_p10, %p1756_p9 }
 0x502   :  { %1764 = shalt.err (!%p1761_p11)
}
 0x503   :  { %1372 = dma.vmem_to_hbm [thread:$0]  %s1370_s1, 256, %s2160_s7, [#allocation12]   ;;  %1290 = vst [vmem:[#allocation13 + $0x8] sm:$0xff] %v1226_v1  ;;  %v1164_v10 = vmul.f32 0.000125, %v850_v8 }
 0x504   :  { %s1765_s5 = scalar_lea.vmem %s2107_s24, 128  ;;  %p1770_p13 = scmp.lt.s32.totalorder %s2107_s24, %s2107_s24 }
 0x505   :  { %p1766_p12 = scmp.ne.s32.totalorder %s2107_s24, %s1765_s5  ;;  %p1771_p0 = scmp.lt.s32.totalorder %s1765_s5, %s1765_s5 }
 0x507   :  { %p1772_p1 = por %p1771_p0, %p1770_p13 }
 0x509   :  { %p1773_p2 = pnand %p1772_p1, %p1766_p12 }
 0x50b   :  { %1776 = shalt.err (!%p1773_p2)
}
 0x50c   :  { %s1777_s13 = scalar_lea.hbm %s2159_s6, 128 }
 0x50d   :  { %p1778_p3 = scmp.ne.s32.totalorder %s2159_s6, %s1777_s13  ;;  %p1781_p4 = scmp.lt.u32.totalorder %s1777_s13, %s2159_s6 }
 0x50f   :  { %p1783_p5 = pnand %p1781_p4, %p1778_p3 }
 0x511   :  { %1786 = shalt.err (!%p1783_p5)
}
 0x512   :  { %1362 = dma.vmem_to_hbm [thread:$0]  %s2107_s24, 128, %s2159_s6, [#allocation4]   ;;  %v1227_v11 = vadd.f32 %v1163_v7, %v1099_v5  ;;  %v1101_v13 = vmul.f32 0.999, %v1037_v6  ;;  %v1228_v12 = vadd.f32 %v1164_v10, %v1100_v47  ;;  %v854_v14 = vpop.f32.mrb[8].mxu0  ;;  %v1039_v16 = vld [vmem:[#allocation8 + $0x30] sm:$0xff] }
 0x513   :  { %v1102_v15 = vmul.f32 0.999, %v1038_v9  ;;  %v1165_v17 = vmul.f32 0.000125, %v854_v14  ;;  %v856_v22 = vpop.f32.mrb[9].mxu0  ;;  %v1040_v18 = vld [vmem:[#allocation8 + $0x38] sm:$0xff] }
 0x514   :  { %1291 = vst [vmem:[#allocation13 + $0x10] sm:$0xff] %v1227_v11  ;;  %1292 = vst [vmem:[#allocation13 + $0x18] sm:$0xff] %v1228_v12  ;;  %v1166_v24 = vmul.f32 0.000125, %v856_v22  ;;  %v1103_v20 = vmul.f32 0.999, %v1039_v16 }
 0x515   :  { %v1229_v19 = vadd.f32 %v1165_v17, %v1101_v13  ;;  %v860_v23 = vpop.f32.mrb[10].mxu0  ;;  %v1104_v26 = vmul.f32 0.999, %v1040_v18  ;;  %v1041_v29 = vld [vmem:[#allocation8 + $0x40] sm:$0xff]  ;;  %v1042_v33 = vld [vmem:[#allocation8 + $0x48] sm:$0xff]  ;;  %v1043_v40 = vld [vmem:[#allocation8 + $0x50] sm:$0xff] }
 0x516   :  { %v1230_v21 = vadd.f32 %v1166_v24, %v1102_v15  ;;  %v1167_v31 = vmul.f32 0.000125, %v860_v23  ;;  %v862_v32 = vpop.f32.mrb[11].mxu0  ;;  %v1105_v36 = vmul.f32 0.999, %v1041_v29  ;;  %v1044_v27 = vld [vmem:[#allocation8 + $0x58] sm:$0xff] }
 0x517   :  { %1293 = vst [vmem:[#allocation13 + $0x20] sm:$0xff] %v1229_v19  ;;  %v1168_v34 = vmul.f32 0.000125, %v862_v32  ;;  %v866_v38 = vpop.f32.mrb[12].mxu0  ;;  %v1106_v39 = vmul.f32 0.999, %v1042_v33 }
 0x518   :  { %1294 = vst [vmem:[#allocation13 + $0x28] sm:$0xff] %v1230_v21  ;;  %v1231_v35 = vadd.f32 %v1167_v31, %v1103_v20  ;;  %v1169_v41 = vmul.f32 0.000125, %v866_v38  ;;  %v868_v44 = vpop.f32.mrb[13].mxu0  ;;  %v1107_v49 = vmul.f32 0.999, %v1043_v40 }
 0x519   :  { %v1232_v37 = vadd.f32 %v1168_v34, %v1104_v26  ;;  %v1170_v28 = vmul.f32 0.000125, %v868_v44  ;;  %v872_v51 = vpop.f32.mrb[14].mxu0  ;;  %v1108_v43 = vmul.f32 0.999, %v1044_v27  ;;  %v1045_v52 = vld [vmem:[#allocation8 + $0x60] sm:$0xff] }
 0x51a   :  { %1295 = vst [vmem:[#allocation13 + $0x30] sm:$0xff] %v1231_v35  ;;  %v1233_v46 = vadd.f32 %v1169_v41, %v1105_v36  ;;  %v1171_v42 = vmul.f32 0.000125, %v872_v51  ;;  %v874_v45 = vpop.f32.mrb[15].mxu0  ;;  %v1046_v53 = vld [vmem:[#allocation8 + $0x68] sm:$0xff]  ;;  %v1047_v25 = vld [vmem:[#allocation8 + $0x70] sm:$0xff] }
 0x51b   :  { %1296 = vst [vmem:[#allocation13 + $0x38] sm:$0xff] %v1232_v37  ;;  %v1234_v50 = vadd.f32 %v1170_v28, %v1106_v39  ;;  %v1172_v48 = vmul.f32 0.000125, %v874_v45  ;;  %v1109_v55 = vmul.f32 0.999, %v1045_v52  ;;  %v878_v57 = vpop.f32.mrb[16].mxu0 }
 0x51c   :  { %1297 = vst [vmem:[#allocation13 + $0x40] sm:$0xff] %v1233_v46  ;;  %v1235_v54 = vadd.f32 %v1171_v42, %v1107_v49  ;;  %v1110_v58 = vmul.f32 0.999, %v1046_v53  ;;  %v1173_v59 = vmul.f32 0.000125, %v878_v57  ;;  %v880_v60 = vpop.f32.mrb[17].mxu0 }
 0x51d   :  { %1298 = vst [vmem:[#allocation13 + $0x48] sm:$0xff] %v1234_v50  ;;  %v1236_v56 = vadd.f32 %v1172_v48, %v1108_v43  ;;  %v1048_v61 = vld [vmem:[#allocation8 + $0x78] sm:$0xff]  ;;  %v1174_v62 = vmul.f32 0.000125, %v880_v60  ;;  %v1111_v0 = vmul.f32 0.999, %v1047_v25 }
 0x51e   :  { %1299 = vst [vmem:[#allocation13 + $0x50] sm:$0xff] %v1235_v54  ;;  %v1237_v63 = vadd.f32 %v1173_v59, %v1109_v55  ;;  %v884_v3 = vpop.f32.mrb[18].mxu0  ;;  %v1112_v4 = vmul.f32 0.999, %v1048_v61  ;;  %v1049_v5 = vld [vmem:[#allocation8 + $0x80] sm:$0xff]  ;;  %v1050_v47 = vld [vmem:[#allocation8 + $0x88] sm:$0xff] }
 0x51f   :  { %1300 = vst [vmem:[#allocation13 + $0x58] sm:$0xff] %v1236_v56  ;;  %v1238_v2 = vadd.f32 %v1174_v62, %v1110_v58  ;;  %v1175_v1 = vmul.f32 0.000125, %v884_v3  ;;  %v886_v30 = vpop.f32.mrb[19].mxu0  ;;  %v1113_v8 = vmul.f32 0.999, %v1049_v5 }
 0x520   :  { %1301 = vst [vmem:[#allocation13 + $0x60] sm:$0xff] %v1237_v63  ;;  %v1176_v6 = vmul.f32 0.000125, %v886_v30  ;;  %v890_v10 = vpop.f32.mrb[20].mxu0  ;;  %v1114_v11 = vmul.f32 0.999, %v1050_v47 }
 0x521   :  { %1302 = vst [vmem:[#allocation13 + $0x68] sm:$0xff] %v1238_v2  ;;  %v1239_v7 = vadd.f32 %v1175_v1, %v1111_v0  ;;  %v1051_v13 = vld [vmem:[#allocation8 + $0x90] sm:$0xff]  ;;  %v1177_v12 = vmul.f32 0.000125, %v890_v10  ;;  %v892_v14 = vpop.f32.mrb[21].mxu0  ;;  %v1052_v15 = vld [vmem:[#allocation8 + $0x98] sm:$0xff] }
 0x522   :  { %v1240_v9 = vadd.f32 %v1176_v6, %v1112_v4  ;;  %v1178_v16 = vmul.f32 0.000125, %v892_v14  ;;  %v1115_v22 = vmul.f32 0.999, %v1051_v13  ;;  %v896_v24 = vpop.f32.mrb[22].mxu0  ;;  %v1053_v20 = vld [vmem:[#allocation8 + $0xa0] sm:$0xff] }
 0x523   :  { %1303 = vst [vmem:[#allocation13 + $0x70] sm:$0xff] %v1239_v7  ;;  %v1241_v17 = vadd.f32 %v1177_v12, %v1113_v8  ;;  %v1116_v19 = vmul.f32 0.999, %v1052_v15  ;;  %v1179_v21 = vmul.f32 0.000125, %v896_v24  ;;  %v898_v23 = vpop.f32.mrb[23].mxu0 }
 0x524   :  { %1304 = vst [vmem:[#allocation13 + $0x78] sm:$0xff] %v1240_v9  ;;  %v1242_v18 = vadd.f32 %v1178_v16, %v1114_v11  ;;  %v1054_v26 = vld [vmem:[#allocation8 + $0xa8] sm:$0xff]  ;;  %v1180_v29 = vmul.f32 0.000125, %v898_v23  ;;  %v1117_v32 = vmul.f32 0.999, %v1053_v20 }
 0x525   :  { %1305 = vst [vmem:[#allocation13 + $0x80] sm:$0xff] %v1241_v17  ;;  %v1243_v31 = vadd.f32 %v1179_v21, %v1115_v22  ;;  %v902_v34 = vpop.f32.mrb[24].mxu0  ;;  %v1118_v35 = vmul.f32 0.999, %v1054_v26  ;;  %v1055_v36 = vld [vmem:[#allocation8 + $0xb0] sm:$0xff]  ;;  %v1056_v39 = vld [vmem:[#allocation8 + $0xb8] sm:$0xff] }
 0x526   :  { %1306 = vst [vmem:[#allocation13 + $0x88] sm:$0xff] %v1242_v18  ;;  %v1244_v33 = vadd.f32 %v1180_v29, %v1116_v19  ;;  %v1181_v37 = vmul.f32 0.000125, %v902_v34  ;;  %v904_v38 = vpop.f32.mrb[25].mxu0  ;;  %v1119_v44 = vmul.f32 0.999, %v1055_v36 }
 0x527   :  { %1307 = vst [vmem:[#allocation13 + $0x90] sm:$0xff] %v1243_v31  ;;  %v1182_v40 = vmul.f32 0.000125, %v904_v38  ;;  %v908_v28 = vpop.f32.mrb[26].mxu0  ;;  %v1120_v46 = vmul.f32 0.999, %v1056_v39 }
 0x528   :  { %1308 = vst [vmem:[#allocation13 + $0x98] sm:$0xff] %v1244_v33  ;;  %v1245_v41 = vadd.f32 %v1181_v37, %v1117_v32  ;;  %v1057_v49 = vld [vmem:[#allocation8 + $0xc0] sm:$0xff]  ;;  %v1183_v50 = vmul.f32 0.000125, %v908_v28  ;;  %v910_v51 = vpop.f32.mrb[27].mxu0  ;;  %v1058_v43 = vld [vmem:[#allocation8 + $0xc8] sm:$0xff] }
 0x529   :  { %v1246_v27 = vadd.f32 %v1182_v40, %v1118_v35  ;;  %v1184_v52 = vmul.f32 0.000125, %v910_v51  ;;  %v1121_v45 = vmul.f32 0.999, %v1057_v49  ;;  %v914_v48 = vpop.f32.mrb[2].mxu1  ;;  %v1059_v55 = vld [vmem:[#allocation8 + $0xd0] sm:$0xff] }
 0x52a   :  { %1309 = vst [vmem:[#allocation13 + $0xa0] sm:$0xff] %v1245_v41  ;;  %v1247_v42 = vadd.f32 %v1183_v50, %v1119_v44  ;;  %v1122_v54 = vmul.f32 0.999, %v1058_v43  ;;  %v1185_v56 = vmul.f32 0.000125, %v914_v48  ;;  %v916_v57 = vpop.f32.mrb[3].mxu1 }
 0x52b   :  { %1310 = vst [vmem:[#allocation13 + $0xa8] sm:$0xff] %v1246_v27  ;;  %v1248_v53 = vadd.f32 %v1184_v52, %v1120_v46  ;;  %v1060_v58 = vld [vmem:[#allocation8 + $0xd8] sm:$0xff]  ;;  %v1186_v25 = vmul.f32 0.000125, %v916_v57  ;;  %v1123_v60 = vmul.f32 0.999, %v1059_v55 }
 0x52c   :  { %1311 = vst [vmem:[#allocation13 + $0xb0] sm:$0xff] %v1247_v42  ;;  %v1249_v59 = vadd.f32 %v1185_v56, %v1121_v45  ;;  %v920_v62 = vpop.f32.mrb[4].mxu1  ;;  %v1124_v63 = vmul.f32 0.999, %v1060_v58  ;;  %v1061_v0 = vld [vmem:[#allocation8 + $0xe0] sm:$0xff]  ;;  %v1062_v4 = vld [vmem:[#allocation8 + $0xe8] sm:$0xff] }
 0x52d   :  { %1312 = vst [vmem:[#allocation13 + $0xb8] sm:$0xff] %v1248_v53  ;;  %v1250_v61 = vadd.f32 %v1186_v25, %v1122_v54  ;;  %v1187_v2 = vmul.f32 0.000125, %v920_v62  ;;  %v922_v3 = vpop.f32.mrb[5].mxu1  ;;  %v1125_v30 = vmul.f32 0.999, %v1061_v0 }
 0x52e   :  { %1313 = vst [vmem:[#allocation13 + $0xc0] sm:$0xff] %v1249_v59  ;;  %v1188_v5 = vmul.f32 0.000125, %v922_v3  ;;  %v926_v6 = vpop.f32.mrb[6].mxu1  ;;  %v1126_v7 = vmul.f32 0.999, %v1062_v4 }
 0x52f   :  { %1314 = vst [vmem:[#allocation13 + $0xc8] sm:$0xff] %v1250_v61  ;;  %v1251_v1 = vadd.f32 %v1187_v2, %v1123_v60  ;;  %v1063_v8 = vld [vmem:[#allocation8 + $0xf0] sm:$0xff]  ;;  %v1189_v9 = vmul.f32 0.000125, %v926_v6  ;;  %v928_v10 = vpop.f32.mrb[7].mxu1  ;;  %v1064_v11 = vld [vmem:[#allocation8 + $0xf8] sm:$0xff] }
 0x530   :  { %v1252_v47 = vadd.f32 %v1188_v5, %v1124_v63  ;;  %v1190_v13 = vmul.f32 0.000125, %v928_v10  ;;  %v1127_v14 = vmul.f32 0.999, %v1063_v8  ;;  %v1128_v17 = vmul.f32 0.999, %v1064_v11 }
 0x531   :  { %1315 = vst [vmem:[#allocation13 + $0xd0] sm:$0xff] %v1251_v1  ;;  %v1253_v12 = vadd.f32 %v1189_v9, %v1125_v30  ;;  %v1065_v22 = vld [vmem:[#allocation8 + $0x100] sm:$0xff]  ;;  %v1066_v19 = vld [vmem:[#allocation8 + $0x108] sm:$0xff]  ;;  %v1067_v32 = vld [vmem:[#allocation8 + $0x110] sm:$0xff]  ;;  %s1838_s6 = smov [#allocation13]  }
 0x532   :  { %1316 = vst [vmem:[#allocation13 + $0xd8] sm:$0xff] %v1252_v47  ;;  %v1254_v15 = vadd.f32 %v1190_v13, %v1126_v7  ;;  %v932_v16 = vpop.f32.mrb[8].mxu1  ;;  %v1129_v23 = vmul.f32 0.999, %v1065_v22  ;;  %v1130_v31 = vmul.f32 0.999, %v1066_v19 }
 0x533   :  { %1317 = vst [vmem:[#allocation13 + $0xe0] sm:$0xff] %v1253_v12  ;;  %v1191_v18 = vmul.f32 0.000125, %v932_v16  ;;  %v934_v24 = vpop.f32.mrb[9].mxu1  ;;  %v1068_v35 = vld [vmem:[#allocation8 + $0x118] sm:$0xff]  ;;  %v1069_v44 = vld [vmem:[#allocation8 + $0x120] sm:$0xff] }
 0x534   :  { %1318 = vst [vmem:[#allocation13 + $0xe8] sm:$0xff] %v1254_v15  ;;  %v1192_v20 = vmul.f32 0.000125, %v934_v24  ;;  %v1131_v38 = vmul.f32 0.999, %v1067_v32  ;;  %v1070_v46 = vld [vmem:[#allocation8 + $0x128] sm:$0xff] }
 0x535   :  { %v1255_v21 = vadd.f32 %v1191_v18, %v1127_v14  ;;  %v1132_v41 = vmul.f32 0.999, %v1068_v35  ;;  %v1133_v51 = vmul.f32 0.999, %v1069_v44  ;;  %v1134_v42 = vmul.f32 0.999, %v1070_v46 }
 0x536   :  { %v1256_v26 = vadd.f32 %v1192_v20, %v1128_v17  ;;  %v938_v29 = vpop.f32.mrb[10].mxu1  ;;  %v1071_v45 = vld [vmem:[#allocation8 + $0x130] sm:$0xff]  ;;  %v1072_v54 = vld [vmem:[#allocation8 + $0x138] sm:$0xff]  ;;  %v1073_v60 = vld [vmem:[#allocation8 + $0x140] sm:$0xff]  ;;  %s1378_s21 = sshll.u32 %s1838_s6, 4  ;;  %s1379_s21 = int_to_ptr.vmem [resolvable:$true] %s1378_s21 }
 0x537   :  { %1319 = vst [vmem:[#allocation13 + $0xf0] sm:$0xff] %v1255_v21  ;;  %v1193_v33 = vmul.f32 0.000125, %v938_v29  ;;  %v940_v34 = vpop.f32.mrb[11].mxu1  ;;  %v1135_v57 = vmul.f32 0.999, %v1071_v45  ;;  %p1792_p7 = scmp.lt.s32.totalorder %s1379_s21, %s1379_s21 }
 0x538   :  { %1320 = vst [vmem:[#allocation13 + $0xf8] sm:$0xff] %v1256_v26  ;;  %v1194_v36 = vmul.f32 0.000125, %v940_v34  ;;  %v1136_v59 = vmul.f32 0.999, %v1072_v54  ;;  %v1074_v63 = vld [vmem:[#allocation8 + $0x148] sm:$0xff] }
 0x539   :  { %v1257_v37 = vadd.f32 %v1193_v33, %v1129_v23  ;;  %v1137_v3 = vmul.f32 0.999, %v1073_v60  ;;  %v1138_v1 = vmul.f32 0.999, %v1074_v63  ;;  %v1075_v30 = vld [vmem:[#allocation8 + $0x150] sm:$0xff]  ;;  %v1076_v7 = vld [vmem:[#allocation8 + $0x158] sm:$0xff] }
 0x53a   :  { %v1258_v39 = vadd.f32 %v1194_v36, %v1130_v31  ;;  %v944_v40 = vpop.f32.mrb[12].mxu1  ;;  %v1139_v10 = vmul.f32 0.999, %v1075_v30  ;;  %v1140_v12 = vmul.f32 0.999, %v1076_v7  ;;  %v1077_v14 = vld [vmem:[#allocation8 + $0x160] sm:$0xff] }
 0x53b   :  { %1321 = vst [vmem:[#allocation13 + $0x100] sm:$0xff] %v1257_v37  ;;  %v1195_v27 = vmul.f32 0.000125, %v944_v40  ;;  %v946_v28 = vpop.f32.mrb[13].mxu1  ;;  %v1078_v17 = vld [vmem:[#allocation8 + $0x168] sm:$0xff]  ;;  %v1079_v23 = vld [vmem:[#allocation8 + $0x170] sm:$0xff] }
 0x53c   :  { %1322 = vst [vmem:[#allocation13 + $0x108] sm:$0xff] %v1258_v39  ;;  %v1196_v49 = vmul.f32 0.000125, %v946_v28  ;;  %v1141_v24 = vmul.f32 0.999, %v1077_v14  ;;  %v1080_v31 = vld [vmem:[#allocation8 + $0x178] sm:$0xff] }
 0x53d   :  { %v1259_v50 = vadd.f32 %v1195_v27, %v1131_v38  ;;  %v1142_v21 = vmul.f32 0.999, %v1078_v17  ;;  %v1143_v34 = vmul.f32 0.999, %v1079_v23  ;;  %v1144_v37 = vmul.f32 0.999, %v1080_v31 }
 0x53e   :  { %v1260_v43 = vadd.f32 %v1196_v49, %v1132_v41  ;;  %v950_v52 = vpop.f32.mrb[14].mxu1  ;;  %v1081_v38 = vld [vmem:[#allocation8 + $0x180] sm:$0xff]  ;;  %v1082_v41 = vld [vmem:[#allocation8 + $0x188] sm:$0xff]  ;;  %s1787_s22 = scalar_lea.vmem %s1379_s21, 8192 }
 0x53f   :  { %1323 = vst [vmem:[#allocation13 + $0x110] sm:$0xff] %v1259_v50  ;;  %v1197_v53 = vmul.f32 0.000125, %v950_v52  ;;  %v952_v48 = vpop.f32.mrb[15].mxu1  ;;  %v1145_v28 = vmul.f32 0.999, %v1081_v38  ;;  %p1788_p6 = scmp.ne.s32.totalorder %s1379_s21, %s1787_s22  ;;  %p1793_p8 = scmp.lt.s32.totalorder %s1787_s22, %s1787_s22 }
 0x540   :  { %1324 = vst [vmem:[#allocation13 + $0x118] sm:$0xff] %v1260_v43  ;;  %v1198_v55 = vmul.f32 0.000125, %v952_v48  ;;  %v1146_v50 = vmul.f32 0.999, %v1082_v41 }
 0x541   :  { %v1261_v56 = vadd.f32 %v1197_v53, %v1133_v51  ;;  %v1083_v51 = vld [vmem:[#allocation8 + $0x190] sm:$0xff]  ;;  %p1794_p9 = por %p1793_p8, %p1792_p7 }
 0x542   :  { %v1262_v58 = vadd.f32 %v1198_v55, %v1134_v42  ;;  %v956_v25 = vpop.f32.mrb[16].mxu1  ;;  %v1084_v42 = vld [vmem:[#allocation8 + $0x198] sm:$0xff]  ;;  %v1147_v48 = vmul.f32 0.999, %v1083_v51 }
 0x543   :  { %1325 = vst [vmem:[#allocation13 + $0x120] sm:$0xff] %v1261_v56  ;;  %v1199_v61 = vmul.f32 0.000125, %v956_v25  ;;  %v958_v62 = vpop.f32.mrb[17].mxu1  ;;  %v1148_v56 = vmul.f32 0.999, %v1084_v42  ;;  %p1795_p10 = pnand %p1794_p9, %p1788_p6 }
 0x544   :  { %1326 = vst [vmem:[#allocation13 + $0x128] sm:$0xff] %v1262_v58  ;;  %v1200_v0 = vmul.f32 0.000125, %v958_v62 }
 0x545   :  { %v1263_v2 = vadd.f32 %v1199_v61, %v1135_v57  ;;  %v1085_v57 = vld [vmem:[#allocation8 + $0x1a0] sm:$0xff] }
 0x546   :  { %v1264_v4 = vadd.f32 %v1200_v0, %v1136_v59  ;;  %v962_v5 = vpop.f32.mrb[18].mxu1  ;;  %v1086_v59 = vld [vmem:[#allocation8 + $0x1a8] sm:$0xff]  ;;  %v1149_v62 = vmul.f32 0.999, %v1085_v57 }
 0x547   :  { %1327 = vst [vmem:[#allocation13 + $0x130] sm:$0xff] %v1263_v2  ;;  %v1201_v47 = vmul.f32 0.000125, %v962_v5  ;;  %v964_v6 = vpop.f32.mrb[19].mxu1  ;;  %v1150_v2 = vmul.f32 0.999, %v1086_v59 }
 0x548   :  { %1328 = vst [vmem:[#allocation13 + $0x138] sm:$0xff] %v1264_v4  ;;  %v1202_v8 = vmul.f32 0.000125, %v964_v6 }
 0x549   :  { %v1265_v9 = vadd.f32 %v1201_v47, %v1137_v3  ;;  %v1087_v3 = vld [vmem:[#allocation8 + $0x1b0] sm:$0xff] }
 0x54a   :  { %v1266_v11 = vadd.f32 %v1202_v8, %v1138_v1  ;;  %v968_v13 = vpop.f32.mrb[20].mxu1  ;;  %v1088_v1 = vld [vmem:[#allocation8 + $0x1b8] sm:$0xff]  ;;  %v1151_v6 = vmul.f32 0.999, %v1087_v3 }
 0x54b   :  { %1329 = vst [vmem:[#allocation13 + $0x140] sm:$0xff] %v1265_v9  ;;  %v1203_v15 = vmul.f32 0.000125, %v968_v13  ;;  %v970_v16 = vpop.f32.mrb[21].mxu1  ;;  %v1152_v9 = vmul.f32 0.999, %v1088_v1 }
 0x54c   :  { %1330 = vst [vmem:[#allocation13 + $0x148] sm:$0xff] %v1266_v11  ;;  %v1204_v22 = vmul.f32 0.000125, %v970_v16 }
 0x54d   :  { %v1267_v18 = vadd.f32 %v1203_v15, %v1139_v10  ;;  %v1089_v10 = vld [vmem:[#allocation8 + $0x1c0] sm:$0xff] }
 0x54e   :  { %v1268_v19 = vadd.f32 %v1204_v22, %v1140_v12  ;;  %v974_v20 = vpop.f32.mrb[22].mxu1  ;;  %v1090_v12 = vld [vmem:[#allocation8 + $0x1c8] sm:$0xff]  ;;  %v1153_v16 = vmul.f32 0.999, %v1089_v10 }
 0x54f   :  { %1331 = vst [vmem:[#allocation13 + $0x150] sm:$0xff] %v1267_v18  ;;  %v1205_v26 = vmul.f32 0.000125, %v974_v20  ;;  %v976_v29 = vpop.f32.mrb[23].mxu1  ;;  %v1154_v18 = vmul.f32 0.999, %v1090_v12 }
 0x550   :  { %1332 = vst [vmem:[#allocation13 + $0x158] sm:$0xff] %v1268_v19  ;;  %v1206_v32 = vmul.f32 0.000125, %v976_v29 }
 0x551   :  { %v1269_v33 = vadd.f32 %v1205_v26, %v1141_v24  ;;  %v1091_v24 = vld [vmem:[#allocation8 + $0x1d0] sm:$0xff] }
 0x552   :  { %v1270_v35 = vadd.f32 %v1206_v32, %v1142_v21  ;;  %v980_v36 = vpop.f32.mrb[24].mxu1  ;;  %v1092_v21 = vld [vmem:[#allocation8 + $0x1d8] sm:$0xff]  ;;  %v1155_v29 = vmul.f32 0.999, %v1091_v24 }
 0x553   :  { %1333 = vst [vmem:[#allocation13 + $0x160] sm:$0xff] %v1269_v33  ;;  %v1207_v39 = vmul.f32 0.000125, %v980_v36  ;;  %v982_v40 = vpop.f32.mrb[25].mxu1  ;;  %v1156_v33 = vmul.f32 0.999, %v1092_v21 }
 0x554   :  { %1334 = vst [vmem:[#allocation13 + $0x168] sm:$0xff] %v1270_v35  ;;  %v1208_v44 = vmul.f32 0.000125, %v982_v40 }
 0x555   :  { %v1271_v27 = vadd.f32 %v1207_v39, %v1143_v34  ;;  %v1093_v34 = vld [vmem:[#allocation8 + $0x1e0] sm:$0xff] }
 0x556   :  { %v1272_v46 = vadd.f32 %v1208_v44, %v1144_v37  ;;  %v986_v49 = vpop.f32.mrb[26].mxu1  ;;  %v1094_v37 = vld [vmem:[#allocation8 + $0x1e8] sm:$0xff]  ;;  %v1157_v40 = vmul.f32 0.999, %v1093_v34 }
 0x557   :  { %1335 = vst [vmem:[#allocation13 + $0x170] sm:$0xff] %v1271_v27  ;;  %v1209_v43 = vmul.f32 0.000125, %v986_v49  ;;  %v988_v52 = vpop.f32.mrb[27].mxu1  ;;  %v1158_v27 = vmul.f32 0.999, %v1094_v37 }
 0x558   :  { %1336 = vst [vmem:[#allocation13 + $0x178] sm:$0xff] %v1272_v46  ;;  %v1210_v45 = vmul.f32 0.000125, %v988_v52 }
 0x559   :  { %v1273_v53 = vadd.f32 %v1209_v43, %v1145_v28  ;;  %v1095_v28 = vld [vmem:[#allocation8 + $0x1f0] sm:$0xff] }
 0x55a   :  { %v1274_v54 = vadd.f32 %v1210_v45, %v1146_v50  ;;  %v992_v55 = vpop.f32.mrb[28].mxu1  ;;  %v1096_v50 = vld [vmem:[#allocation8 + $0x1f8] sm:$0xff]  ;;  %v1159_v52 = vmul.f32 0.999, %v1095_v28 }
 0x55b   :  { %1337 = vst [vmem:[#allocation13 + $0x180] sm:$0xff] %v1273_v53  ;;  %v1211_v58 = vmul.f32 0.000125, %v992_v55  ;;  %v994_v25 = vpop.f32.mrb[29].mxu1  ;;  %v1160_v53 = vmul.f32 0.999, %v1096_v50 }
 0x55c   :  { %1338 = vst [vmem:[#allocation13 + $0x188] sm:$0xff] %v1274_v54  ;;  %v1212_v60 = vmul.f32 0.000125, %v994_v25 }
 0x55d   :  { %v1275_v61 = vadd.f32 %v1211_v58, %v1147_v48 }
 0x55e   :  { %v1276_v63 = vadd.f32 %v1212_v60, %v1148_v56  ;;  %v998_v0 = vpop.f32.mrb[30].mxu1 }
 0x55f   :  { %1339 = vst [vmem:[#allocation13 + $0x190] sm:$0xff] %v1275_v61  ;;  %v1213_v4 = vmul.f32 0.000125, %v998_v0  ;;  %v1000_v5 = vpop.f32.mrb[31].mxu1 }
 0x560   :  { %1340 = vst [vmem:[#allocation13 + $0x198] sm:$0xff] %v1276_v63  ;;  %v1214_v30 = vmul.f32 0.000125, %v1000_v5 }
 0x561   :  { %v1277_v47 = vadd.f32 %v1213_v4, %v1149_v62 }
 0x562   :  { %v1278_v7 = vadd.f32 %v1214_v30, %v1150_v2  ;;  %v1004_v8 = vpop.f32.mrb[32].mxu1 }
 0x563   :  { %1341 = vst [vmem:[#allocation13 + $0x1a0] sm:$0xff] %v1277_v47  ;;  %v1215_v11 = vmul.f32 0.000125, %v1004_v8  ;;  %v1006_v13 = vpop.f32.mrb[33].mxu1 }
 0x564   :  { %1342 = vst [vmem:[#allocation13 + $0x1a8] sm:$0xff] %v1278_v7  ;;  %v1216_v14 = vmul.f32 0.000125, %v1006_v13 }
 0x565   :  { %v1279_v15 = vadd.f32 %v1215_v11, %v1151_v6 }
 0x566   :  { %v1280_v17 = vadd.f32 %v1216_v14, %v1152_v9  ;;  %v1010_v22 = vpop.f32.mrb[34].mxu1 }
 0x567   :  { %1343 = vst [vmem:[#allocation13 + $0x1b0] sm:$0xff] %v1279_v15  ;;  %v1217_v19 = vmul.f32 0.000125, %v1010_v22  ;;  %v1012_v20 = vpop.f32.mrb[35].mxu1 }
 0x568   :  { %1344 = vst [vmem:[#allocation13 + $0x1b8] sm:$0xff] %v1280_v17  ;;  %v1218_v23 = vmul.f32 0.000125, %v1012_v20 }
 0x569   :  { %v1281_v26 = vadd.f32 %v1217_v19, %v1153_v16 }
 0x56a   :  { %v1282_v31 = vadd.f32 %v1218_v23, %v1154_v18  ;;  %v1016_v32 = vpop.f32.mrb[36].mxu1 }
 0x56b   :  { %1345 = vst [vmem:[#allocation13 + $0x1c0] sm:$0xff] %v1281_v26  ;;  %v1219_v35 = vmul.f32 0.000125, %v1016_v32  ;;  %v1018_v36 = vpop.f32.mrb[37].mxu1 }
 0x56c   :  { %1346 = vst [vmem:[#allocation13 + $0x1c8] sm:$0xff] %v1282_v31  ;;  %v1220_v38 = vmul.f32 0.000125, %v1018_v36 }
 0x56d   :  { %v1283_v39 = vadd.f32 %v1219_v35, %v1155_v29 }
 0x56e   :  { %v1284_v41 = vadd.f32 %v1220_v38, %v1156_v33  ;;  %v1022_v44 = vpop.f32.mrb[38].mxu1 }
 0x56f   :  { %1347 = vst [vmem:[#allocation13 + $0x1d0] sm:$0xff] %v1283_v39  ;;  %v1221_v46 = vmul.f32 0.000125, %v1022_v44  ;;  %v1024_v49 = vpop.f32.mrb[39].mxu1 }
 0x570   :  { %1348 = vst [vmem:[#allocation13 + $0x1d8] sm:$0xff] %v1284_v41  ;;  %v1222_v51 = vmul.f32 0.000125, %v1024_v49 }
 0x571   :  { %v1285_v43 = vadd.f32 %v1221_v46, %v1157_v40 }
 0x572   :  { %v1286_v42 = vadd.f32 %v1222_v51, %v1158_v27  ;;  %v1028_v45 = vpop.f32.mrb[40].mxu1 }
 0x573   :  { %1349 = vst [vmem:[#allocation13 + $0x1e0] sm:$0xff] %v1285_v43  ;;  %v1223_v48 = vmul.f32 0.000125, %v1028_v45  ;;  %v1030_v54 = vpop.f32.mrb[41].mxu1 }
 0x574   :  { %1350 = vst [vmem:[#allocation13 + $0x1e8] sm:$0xff] %v1286_v42  ;;  %v1224_v55 = vmul.f32 0.000125, %v1030_v54 }
 0x575   :  { %v1287_v56 = vadd.f32 %v1223_v48, %v1159_v52 }
 0x576   :  { %v1288_v57 = vadd.f32 %v1224_v55, %v1160_v53 }
 0x577   :  { %1351 = vst [vmem:[#allocation13 + $0x1f0] sm:$0xff] %v1287_v56 }
 0x578   :  { %1352 = vst [vmem:[#allocation13 + $0x1f8] sm:$0xff] %v1288_v57 }
 0x579   :  { %1798 = shalt.err (!%p1795_p10)
}
 0x57a   :  { %s1799_s1 = scalar_lea.hbm %s2161_s8, 8192 }
 0x57b   :  { %p1800_p11 = scmp.ne.s32.totalorder %s2161_s8, %s1799_s1  ;;  %p1803_p12 = scmp.lt.u32.totalorder %s1799_s1, %s2161_s8 }
 0x57d   :  { %p1805_p13 = pnand %p1803_p12, %p1800_p11 }
 0x57f   :  { %1808 = shalt.err (!%p1805_p13)
}
 0x580   :  { %1384 = dma.vmem_to_hbm [thread:$0]  %s1379_s21, 8192, %s2161_s8, [#allocation12], %s1820_s15, %s1820_s15, %s1821_s16  }
 0x581   :  { %1815 = dma.done.wait [#allocation4], 128  }
 0x582   :  { %1816 = vsyncadd [#allocation4], 4294967168 }
 0x583   :  { %1817 = dma.done.wait [#allocation12], 8448  }
 0x584   :  { %1818 = vsyncadd [#allocation12], 4294958848 }
 0x585   :  { %1394 = vsyncpa [#allocation3], 1 }
 0x586   :  { %1395 = vsyncpa [#allocation6], 1 }
 0x587   :  { %1396 = vsyncpa [#allocation9], 1 }
 0x588   :  { %1397 = vsyncpa [#allocation4], 1 }
 0x589   :  { %1398 = vsyncpa [#allocation12], 1 }

</bundles_post_ra>
